<compile_context>
chip_gen: v5e
topology: v5e:2x2
jax: 0.10.0
libtpu: 0.0.40
codegen_flags: <defaults>
</compile_context>

<pallas_src>
import functools

import jax
import jax.numpy as jnp
from jax.experimental import pallas as pl
from jax.experimental.pallas import tpu as pltpu


def _gru_agent_kernel(x_ref, h0_ref,
                      w1_ref, b1_ref,
                      wir_ref, wiz_ref, win_ref,
                      whr_ref, whz_ref, whn_ref,
                      br_ref, bz_ref, bni_ref, bnh_ref,
                      w2_ref, b2_ref,
                      q_ref, hfin_ref,
                      gir_scr, giz_scr, gin_scr, hall_scr, h_scr):
    """Whole forward pass in one invocation.

    x_ref is time-major 2-D: row index = t*B + b, so each time step is a
    contiguous, lane-dense (B, H) slab of the gate scratches.
    """
    B, H = h0_ref.shape
    TB = x_ref.shape[0]
    T = TB // B

    # ---- batched, time-independent stage (one MXU matmul each) ----
    x = x_ref[...].astype(jnp.float32)                                  # (T*B, F)
    a = jnp.maximum(
        jnp.dot(x, w1_ref[...], preferred_element_type=jnp.float32) + b1_ref[...],
        0.0)                                                            # (T*B, H)

    # b_hh already folded into br/bz; bni = b_ih_n only (b_hh_n applied inside r*(.)).
    gir_scr[...] = jnp.dot(a, wir_ref[...], preferred_element_type=jnp.float32) + br_ref[...]
    giz_scr[...] = jnp.dot(a, wiz_ref[...], preferred_element_type=jnp.float32) + bz_ref[...]
    gin_scr[...] = jnp.dot(a, win_ref[...], preferred_element_type=jnp.float32) + bni_ref[...]

    h_scr[...] = h0_ref[...].astype(jnp.float32)

    whr = whr_ref[...]
    whz = whz_ref[...]
    whn = whn_ref[...]
    bnh = bnh_ref[...]

    # ---- serial recurrence: only h @ W_hh + gate elementwise math ----
    def step(t, carry):
        row = pl.multiple_of(t * B, B)
        sl = pl.ds(row, B)
        h_prev = h_scr[...]                                             # (B, H)
        r = jax.nn.sigmoid(
            gir_scr[sl, :]
            + jnp.dot(h_prev, whr, preferred_element_type=jnp.float32))
        z = jax.nn.sigmoid(
            giz_scr[sl, :]
            + jnp.dot(h_prev, whz, preferred_element_type=jnp.float32))
        n = jnp.tanh(
            gin_scr[sl, :]
            + r * (jnp.dot(h_prev, whn, preferred_element_type=jnp.float32) + bnh))
        h_new = (1.0 - z) * n + z * h_prev
        h_scr[...] = h_new
        hall_scr[sl, :] = h_new
        return carry

    jax.lax.fori_loop(0, T, step, 0, unroll=True)

    # ---- batched fc2 + single lane-dense store, once after the loop ----
    q = jnp.dot(hall_scr[...], w2_ref[...], preferred_element_type=jnp.float32) + b2_ref[...]
    q_ref[...] = q.astype(q_ref.dtype)                                  # (T*B, A)
    hfin_ref[...] = h_scr[...].astype(hfin_ref.dtype)                   # final hidden


def rnn_agent_emc_forward(inputs, hidden_state, params):
    """inputs: (B, T, F) float32; hidden_state: (B, H) float32.

    Returns (q, h) with q: (B, T, A), h: (1, B, H) — same as the PyTorch module.
    """
    B, T, F = inputs.shape
    H = params["fc1_w"].shape[1]
    A = params["fc2_w"].shape[1]

    # Time-major 2-D view (row = t*B + b) so each step is a contiguous slab.
    x2d = jnp.transpose(inputs, (1, 0, 2)).reshape(T * B, F)

    # Per-gate weight split + bias folding (r/z: b_ih+b_hh; n gate kept split).
    w_ih, w_hh = params["w_ih_t"], params["w_hh_t"]
    b_ih, b_hh = params["b_ih"], params["b_hh"]
    wir, wiz, win = w_ih[:, :H], w_ih[:, H:2 * H], w_ih[:, 2 * H:]
    whr, whz, whn = w_hh[:, :H], w_hh[:, H:2 * H], w_hh[:, 2 * H:]
    br = b_ih[:, :H] + b_hh[:, :H]
    bz = b_ih[:, H:2 * H] + b_hh[:, H:2 * H]
    bni = b_ih[:, 2 * H:]
    bnh = b_hh[:, 2 * H:]

    vmem = pl.BlockSpec(memory_space=pltpu.MemorySpace.VMEM)

    q2d, h_out = pl.pallas_call(
        _gru_agent_kernel,
        out_shape=(
            jax.ShapeDtypeStruct((T * B, A), jnp.float32),
            jax.ShapeDtypeStruct((B, H), jnp.float32),
        ),
        in_specs=[vmem] * 16,
        out_specs=(vmem, vmem),
        scratch_shapes=[
            pltpu.VMEM((T * B, H), jnp.float32),   # gi_r  (pre-computed, all t)
            pltpu.VMEM((T * B, H), jnp.float32),   # gi_z
            pltpu.VMEM((T * B, H), jnp.float32),   # gi_n
            pltpu.VMEM((T * B, H), jnp.float32),   # h_t for every t (for batched fc2)
            pltpu.VMEM((B, H), jnp.float32),       # running hidden state
        ],
    )(
        x2d, hidden_state,
        params["fc1_w"], params["fc1_b"],
        wir, wiz, win, whr, whz, whn,
        br, bz, bni, bnh,
        params["fc2_w"], params["fc2_b"],
    )

    q = jnp.transpose(q2d.reshape(T, B, A), (1, 0, 2))     # back to (B, T, A)
    return q, h_out[None]                                   # (1, B, H)


def _reference_forward(inputs, hidden_state, params):
    """Pure-JAX reference mirroring the PyTorch module, for verification."""
    B, T, F = inputs.shape
    H = params["fc1_w"].shape[1]
    x = jax.nn.relu(inputs.reshape(B * T, F) @ params["fc1_w"] + params["fc1_b"][0])
    x = x.reshape(B, T, H)

    def step(h, x_t):
        gi = x_t @ params["w_ih_t"] + params["b_ih"][0]
        gh = h @ params["w_hh_t"] + params["b_hh"][0]
        r = jax.nn.sigmoid(gi[:, :H] + gh[:, :H])
        z = jax.nn.sigmoid(gi[:, H:2 * H] + gh[:, H:2 * H])
        n = jnp.tanh(gi[:, 2 * H:] + r * gh[:, 2 * H:])
        h_new = (1.0 - z) * n + z * h
        return h_new, h_new

    h_fin, ys = jax.lax.scan(step, hidden_state, jnp.transpose(x, (1, 0, 2)))
    ys = jnp.transpose(ys, (1, 0, 2)).reshape(B * T, H)
    q = ys @ params["fc2_w"] + params["fc2_b"][0]
    return q.reshape(B, T, -1), h_fin[None]


def make_params(key, feat, hidden, n_actions):
    ks = jax.random.split(key, 10)
    s = 0.1
    return {
        # fc1: Linear(feat, hidden)       (stored transposed: (in, out))
        "fc1_w": s * jax.random.normal(ks[0], (feat, hidden), jnp.float32),
        "fc1_b": s * jax.random.normal(ks[1], (1, hidden), jnp.float32),
        # GRU: weight_ih (3H, H_in) / weight_hh (3H, H) — stored transposed
        "w_ih_t": s * jax.random.normal(ks[2], (hidden, 3 * hidden), jnp.float32),
        "w_hh_t": s * jax.random.normal(ks[3], (hidden, 3 * hidden), jnp.float32),
        "b_ih": s * jax.random.normal(ks[4], (1, 3 * hidden), jnp.float32),
        "b_hh": s * jax.random.normal(ks[5], (1, 3 * hidden), jnp.float32),
        # fc2: Linear(hidden, n_actions)
        "fc2_w": s * jax.random.normal(ks[6], (hidden, n_actions), jnp.float32),
        "fc2_b": s * jax.random.normal(ks[7], (1, n_actions), jnp.float32),
    }


if __name__ == "__main__":
    B, T, FEAT, HID, ACT = 2, 8, 24, 32, 6

    key = jax.random.PRNGKey(0)
    k_in, k_h, k_p = jax.random.split(key, 3)

    inputs = jax.random.normal(k_in, (B, T, FEAT), jnp.float32)
    # init_hidden() is zeros in the module; use small randoms to exercise the GRU path.
    hidden = 0.1 * jax.random.normal(k_h, (B, HID), jnp.float32)
    params = make_params(k_p, FEAT, HID, ACT)

    fwd = jax.jit(functools.partial(rnn_agent_emc_forward, params=params))
    q, h = fwd(inputs, hidden)
    jax.block_until_ready((q, h))

    q_ref, h_ref = _reference_forward(inputs, hidden, params)
    assert q.shape == (B, T, ACT) and h.shape == (1, B, HID)
    assert jnp.allclose(q, q_ref, atol=1e-4, rtol=1e-4)
    assert jnp.allclose(h, h_ref, atol=1e-4, rtol=1e-4)

    print("KERNEL_OK")
</pallas_src>

<mosaic_0001>
module attributes {stable_mosaic.version = 11 : i64} {
  func.func @_gru_agent_kernel(%arg0: memref<16x24xf32, #tpu.memory_space<vmem>>, %arg1: memref<2x32xf32, #tpu.memory_space<vmem>>, %arg2: memref<24x32xf32, #tpu.memory_space<vmem>>, %arg3: memref<1x32xf32, #tpu.memory_space<vmem>>, %arg4: memref<32x32xf32, #tpu.memory_space<vmem>>, %arg5: memref<32x32xf32, #tpu.memory_space<vmem>>, %arg6: memref<32x32xf32, #tpu.memory_space<vmem>>, %arg7: memref<32x32xf32, #tpu.memory_space<vmem>>, %arg8: memref<32x32xf32, #tpu.memory_space<vmem>>, %arg9: memref<32x32xf32, #tpu.memory_space<vmem>>, %arg10: memref<1x32xf32, #tpu.memory_space<vmem>>, %arg11: memref<1x32xf32, #tpu.memory_space<vmem>>, %arg12: memref<1x32xf32, #tpu.memory_space<vmem>>, %arg13: memref<1x32xf32, #tpu.memory_space<vmem>>, %arg14: memref<32x6xf32, #tpu.memory_space<vmem>>, %arg15: memref<1x6xf32, #tpu.memory_space<vmem>>, %arg16: memref<16x6xf32, #tpu.memory_space<vmem>>, %arg17: memref<2x32xf32, #tpu.memory_space<vmem>>, %arg18: memref<16x32xf32, #tpu.memory_space<vmem>>, %arg19: memref<16x32xf32, #tpu.memory_space<vmem>>, %arg20: memref<16x32xf32, #tpu.memory_space<vmem>>, %arg21: memref<16x32xf32, #tpu.memory_space<vmem>>, %arg22: memref<2x32xf32, #tpu.memory_space<vmem>>) attributes {dimension_semantics = [], scalar_prefetch = 0 : i64, scratch_operands = 5 : i64, tpu.core_type = #tpu.core_type<tc>} {
    %c0 = arith.constant 0 : index
    %c0_0 = arith.constant 0 : index
    %0 = vector.load %arg0[%c0, %c0_0] : memref<16x24xf32, #tpu.memory_space<vmem>>, vector<16x24xf32>
    %c0_1 = arith.constant 0 : index
    %c0_2 = arith.constant 0 : index
    %1 = vector.load %arg2[%c0_1, %c0_2] : memref<24x32xf32, #tpu.memory_space<vmem>>, vector<24x32xf32>
    %cst = arith.constant dense<0.000000e+00> : vector<16x32xf32>
    %2 = tpu.matmul %0, %1, %cst {dimension_numbers = #tpu.dot_dimension_numbers<[1], [0], [0], [1], [0, 0, 1, 1], [], []>} : vector<16x24xf32>, vector<24x32xf32>, vector<16x32xf32> -> vector<16x32xf32>
    %c0_3 = arith.constant 0 : index
    %c0_4 = arith.constant 0 : index
    %3 = vector.load %arg3[%c0_3, %c0_4] : memref<1x32xf32, #tpu.memory_space<vmem>>, vector<1x32xf32>
    %4 = vector.broadcast %3 : vector<1x32xf32> to vector<16x32xf32>
    %5 = arith.addf %2, %4 : vector<16x32xf32>
    %cst_5 = arith.constant 0.000000e+00 : f32
    %6 = vector.broadcast %cst_5 : f32 to vector<16x32xf32>
    %7 = arith.maximumf %5, %6 : vector<16x32xf32>
    %c0_6 = arith.constant 0 : index
    %c0_7 = arith.constant 0 : index
    %8 = vector.load %arg4[%c0_6, %c0_7] : memref<32x32xf32, #tpu.memory_space<vmem>>, vector<32x32xf32>
    %cst_8 = arith.constant dense<0.000000e+00> : vector<16x32xf32>
    %9 = tpu.matmul %7, %8, %cst_8 {dimension_numbers = #tpu.dot_dimension_numbers<[1], [0], [0], [1], [0, 0, 1, 1], [], []>} : vector<16x32xf32>, vector<32x32xf32>, vector<16x32xf32> -> vector<16x32xf32>
    %c0_9 = arith.constant 0 : index
    %c0_10 = arith.constant 0 : index
    %10 = vector.load %arg10[%c0_9, %c0_10] : memref<1x32xf32, #tpu.memory_space<vmem>>, vector<1x32xf32>
    %11 = vector.broadcast %10 : vector<1x32xf32> to vector<16x32xf32>
    %12 = arith.addf %9, %11 : vector<16x32xf32>
    %c0_11 = arith.constant 0 : index
    %c0_12 = arith.constant 0 : index
    %13 = vector.load %arg18[%c0_11, %c0_12] : memref<16x32xf32, #tpu.memory_space<vmem>>, vector<16x32xf32>
    tpu.vector_store %arg18[%c0_11, %c0_12], %12 {strides = array<i32>} : memref<16x32xf32, #tpu.memory_space<vmem>>, vector<16x32xf32>,
    %c0_13 = arith.constant 0 : index
    %c0_14 = arith.constant 0 : index
    %14 = vector.load %arg5[%c0_13, %c0_14] : memref<32x32xf32, #tpu.memory_space<vmem>>, vector<32x32xf32>
    %cst_15 = arith.constant dense<0.000000e+00> : vector<16x32xf32>
    %15 = tpu.matmul %7, %14, %cst_15 {dimension_numbers = #tpu.dot_dimension_numbers<[1], [0], [0], [1], [0, 0, 1, 1], [], []>} : vector<16x32xf32>, vector<32x32xf32>, vector<16x32xf32> -> vector<16x32xf32>
    %c0_16 = arith.constant 0 : index
    %c0_17 = arith.constant 0 : index
    %16 = vector.load %arg11[%c0_16, %c0_17] : memref<1x32xf32, #tpu.memory_space<vmem>>, vector<1x32xf32>
    %17 = vector.broadcast %16 : vector<1x32xf32> to vector<16x32xf32>
    %18 = arith.addf %15, %17 : vector<16x32xf32>
    %c0_18 = arith.constant 0 : index
    %c0_19 = arith.constant 0 : index
    %19 = vector.load %arg19[%c0_18, %c0_19] : memref<16x32xf32, #tpu.memory_space<vmem>>, vector<16x32xf32>
    tpu.vector_store %arg19[%c0_18, %c0_19], %18 {strides = array<i32>} : memref<16x32xf32, #tpu.memory_space<vmem>>, vector<16x32xf32>,
    %c0_20 = arith.constant 0 : index
    %c0_21 = arith.constant 0 : index
    %20 = vector.load %arg6[%c0_20, %c0_21] : memref<32x32xf32, #tpu.memory_space<vmem>>, vector<32x32xf32>
    %cst_22 = arith.constant dense<0.000000e+00> : vector<16x32xf32>
    %21 = tpu.matmul %7, %20, %cst_22 {dimension_numbers = #tpu.dot_dimension_numbers<[1], [0], [0], [1], [0, 0, 1, 1], [], []>} : vector<16x32xf32>, vector<32x32xf32>, vector<16x32xf32> -> vector<16x32xf32>
    %c0_23 = arith.constant 0 : index
    %c0_24 = arith.constant 0 : index
    %22 = vector.load %arg12[%c0_23, %c0_24] : memref<1x32xf32, #tpu.memory_space<vmem>>, vector<1x32xf32>
    %23 = vector.broadcast %22 : vector<1x32xf32> to vector<16x32xf32>
    %24 = arith.addf %21, %23 : vector<16x32xf32>
    %c0_25 = arith.constant 0 : index
    %c0_26 = arith.constant 0 : index
    %25 = vector.load %arg20[%c0_25, %c0_26] : memref<16x32xf32, #tpu.memory_space<vmem>>, vector<16x32xf32>
    tpu.vector_store %arg20[%c0_25, %c0_26], %24 {strides = array<i32>} : memref<16x32xf32, #tpu.memory_space<vmem>>, vector<16x32xf32>,
    %c0_27 = arith.constant 0 : index
    %c0_28 = arith.constant 0 : index
    %26 = vector.load %arg1[%c0_27, %c0_28] : memref<2x32xf32, #tpu.memory_space<vmem>>, vector<2x32xf32>
    %c0_29 = arith.constant 0 : index
    %c0_30 = arith.constant 0 : index
    %27 = vector.load %arg22[%c0_29, %c0_30] : memref<2x32xf32, #tpu.memory_space<vmem>>, vector<2x32xf32>
    tpu.vector_store %arg22[%c0_29, %c0_30], %26 {strides = array<i32>} : memref<2x32xf32, #tpu.memory_space<vmem>>, vector<2x32xf32>,
    %c0_31 = arith.constant 0 : index
    %c0_32 = arith.constant 0 : index
    %28 = vector.load %arg7[%c0_31, %c0_32] : memref<32x32xf32, #tpu.memory_space<vmem>>, vector<32x32xf32>
    %c0_33 = arith.constant 0 : index
    %c0_34 = arith.constant 0 : index
    %29 = vector.load %arg8[%c0_33, %c0_34] : memref<32x32xf32, #tpu.memory_space<vmem>>, vector<32x32xf32>
    %c0_35 = arith.constant 0 : index
    %c0_36 = arith.constant 0 : index
    %30 = vector.load %arg9[%c0_35, %c0_36] : memref<32x32xf32, #tpu.memory_space<vmem>>, vector<32x32xf32>
    %c0_37 = arith.constant 0 : index
    %c0_38 = arith.constant 0 : index
    %31 = vector.load %arg13[%c0_37, %c0_38] : memref<1x32xf32, #tpu.memory_space<vmem>>, vector<1x32xf32>
    %c0_i32 = arith.constant 0 : i32
    %c2_i32 = arith.constant 2 : i32
    %32 = arith.muli %c0_i32, %c2_i32 : i32
    %33 = tpu.assume_multiple %32, 2 : i32
    %c0_39 = arith.constant 0 : index
    %c0_40 = arith.constant 0 : index
    %34 = vector.load %arg22[%c0_39, %c0_40] : memref<2x32xf32, #tpu.memory_space<vmem>>, vector<2x32xf32>
    %35 = arith.index_cast %33 : i32 to index
    %c0_41 = arith.constant 0 : index
    %36 = vector.load %arg18[%35, %c0_41] : memref<16x32xf32, #tpu.memory_space<vmem>>, vector<2x32xf32>
    %cst_42 = arith.constant dense<0.000000e+00> : vector<2x32xf32>
    %37 = tpu.matmul %34, %28, %cst_42 {dimension_numbers = #tpu.dot_dimension_numbers<[1], [0], [0], [1], [0, 0, 1, 1], [], []>} : vector<2x32xf32>, vector<32x32xf32>, vector<2x32xf32> -> vector<2x32xf32>
    %38 = arith.addf %36, %37 : vector<2x32xf32>
    %39 = arith.negf %38 : vector<2x32xf32>
    %40 = math.exp %39 : vector<2x32xf32>
    %cst_43 = arith.constant 1.000000e+00 : f32
    %41 = vector.broadcast %cst_43 : f32 to vector<2x32xf32>
    %42 = arith.addf %41, %40 : vector<2x32xf32>
    %43 = arith.divf %41, %42 : vector<2x32xf32>
    %44 = arith.index_cast %33 : i32 to index
    %c0_44 = arith.constant 0 : index
    %45 = vector.load %arg19[%44, %c0_44] : memref<16x32xf32, #tpu.memory_space<vmem>>, vector<2x32xf32>
    %cst_45 = arith.constant dense<0.000000e+00> : vector<2x32xf32>
    %46 = tpu.matmul %34, %29, %cst_45 {dimension_numbers = #tpu.dot_dimension_numbers<[1], [0], [0], [1], [0, 0, 1, 1], [], []>} : vector<2x32xf32>, vector<32x32xf32>, vector<2x32xf32> -> vector<2x32xf32>
    %47 = arith.addf %45, %46 : vector<2x32xf32>
    %48 = arith.negf %47 : vector<2x32xf32>
    %49 = math.exp %48 : vector<2x32xf32>
    %cst_46 = arith.constant 1.000000e+00 : f32
    %50 = vector.broadcast %cst_46 : f32 to vector<2x32xf32>
    %51 = arith.addf %50, %49 : vector<2x32xf32>
    %52 = arith.divf %50, %51 : vector<2x32xf32>
    %53 = arith.index_cast %33 : i32 to index
    %c0_47 = arith.constant 0 : index
    %54 = vector.load %arg20[%53, %c0_47] : memref<16x32xf32, #tpu.memory_space<vmem>>, vector<2x32xf32>
    %cst_48 = arith.constant dense<0.000000e+00> : vector<2x32xf32>
    %55 = tpu.matmul %34, %30, %cst_48 {dimension_numbers = #tpu.dot_dimension_numbers<[1], [0], [0], [1], [0, 0, 1, 1], [], []>} : vector<2x32xf32>, vector<32x32xf32>, vector<2x32xf32> -> vector<2x32xf32>
    %56 = vector.broadcast %31 : vector<1x32xf32> to vector<2x32xf32>
    %57 = arith.addf %55, %56 : vector<2x32xf32>
    %58 = arith.mulf %43, %57 : vector<2x32xf32>
    %59 = arith.addf %54, %58 : vector<2x32xf32>
    %60 = math.tanh %59 : vector<2x32xf32>
    %cst_49 = arith.constant 1.000000e+00 : f32
    %61 = vector.broadcast %cst_49 : f32 to vector<2x32xf32>
    %62 = arith.subf %61, %52 : vector<2x32xf32>
    %63 = arith.mulf %62, %60 : vector<2x32xf32>
    %64 = arith.mulf %52, %34 : vector<2x32xf32>
    %65 = arith.addf %63, %64 : vector<2x32xf32>
    %c0_50 = arith.constant 0 : index
    %c0_51 = arith.constant 0 : index
    %66 = vector.load %arg22[%c0_50, %c0_51] : memref<2x32xf32, #tpu.memory_space<vmem>>, vector<2x32xf32>
    tpu.vector_store %arg22[%c0_50, %c0_51], %65 {strides = array<i32>} : memref<2x32xf32, #tpu.memory_space<vmem>>, vector<2x32xf32>,
    %67 = arith.index_cast %33 : i32 to index
    %c0_52 = arith.constant 0 : index
    %68 = vector.load %arg21[%67, %c0_52] : memref<16x32xf32, #tpu.memory_space<vmem>>, vector<2x32xf32>
    tpu.vector_store %arg21[%67, %c0_52], %65 {strides = array<i32>} : memref<16x32xf32, #tpu.memory_space<vmem>>, vector<2x32xf32>,
    %c1_i32 = arith.constant 1 : i32
    %c2_i32_53 = arith.constant 2 : i32
    %69 = arith.muli %c1_i32, %c2_i32_53 : i32
    %70 = tpu.assume_multiple %69, 2 : i32
    %c0_54 = arith.constant 0 : index
    %c0_55 = arith.constant 0 : index
    %71 = vector.load %arg22[%c0_54, %c0_55] : memref<2x32xf32, #tpu.memory_space<vmem>>, vector<2x32xf32>
    %72 = arith.index_cast %70 : i32 to index
    %c0_56 = arith.constant 0 : index
    %73 = vector.load %arg18[%72, %c0_56] : memref<16x32xf32, #tpu.memory_space<vmem>>, vector<2x32xf32>
    %cst_57 = arith.constant dense<0.000000e+00> : vector<2x32xf32>
    %74 = tpu.matmul %71, %28, %cst_57 {dimension_numbers = #tpu.dot_dimension_numbers<[1], [0], [0], [1], [0, 0, 1, 1], [], []>} : vector<2x32xf32>, vector<32x32xf32>, vector<2x32xf32> -> vector<2x32xf32>
    %75 = arith.addf %73, %74 : vector<2x32xf32>
    %76 = arith.negf %75 : vector<2x32xf32>
    %77 = math.exp %76 : vector<2x32xf32>
    %cst_58 = arith.constant 1.000000e+00 : f32
    %78 = vector.broadcast %cst_58 : f32 to vector<2x32xf32>
    %79 = arith.addf %78, %77 : vector<2x32xf32>
    %80 = arith.divf %78, %79 : vector<2x32xf32>
    %81 = arith.index_cast %70 : i32 to index
    %c0_59 = arith.constant 0 : index
    %82 = vector.load %arg19[%81, %c0_59] : memref<16x32xf32, #tpu.memory_space<vmem>>, vector<2x32xf32>
    %cst_60 = arith.constant dense<0.000000e+00> : vector<2x32xf32>
    %83 = tpu.matmul %71, %29, %cst_60 {dimension_numbers = #tpu.dot_dimension_numbers<[1], [0], [0], [1], [0, 0, 1, 1], [], []>} : vector<2x32xf32>, vector<32x32xf32>, vector<2x32xf32> -> vector<2x32xf32>
    %84 = arith.addf %82, %83 : vector<2x32xf32>
    %85 = arith.negf %84 : vector<2x32xf32>
    %86 = math.exp %85 : vector<2x32xf32>
    %cst_61 = arith.constant 1.000000e+00 : f32
    %87 = vector.broadcast %cst_61 : f32 to vector<2x32xf32>
    %88 = arith.addf %87, %86 : vector<2x32xf32>
    %89 = arith.divf %87, %88 : vector<2x32xf32>
    %90 = arith.index_cast %70 : i32 to index
    %c0_62 = arith.constant 0 : index
    %91 = vector.load %arg20[%90, %c0_62] : memref<16x32xf32, #tpu.memory_space<vmem>>, vector<2x32xf32>
    %cst_63 = arith.constant dense<0.000000e+00> : vector<2x32xf32>
    %92 = tpu.matmul %71, %30, %cst_63 {dimension_numbers = #tpu.dot_dimension_numbers<[1], [0], [0], [1], [0, 0, 1, 1], [], []>} : vector<2x32xf32>, vector<32x32xf32>, vector<2x32xf32> -> vector<2x32xf32>
    %93 = vector.broadcast %31 : vector<1x32xf32> to vector<2x32xf32>
    %94 = arith.addf %92, %93 : vector<2x32xf32>
    %95 = arith.mulf %80, %94 : vector<2x32xf32>
    %96 = arith.addf %91, %95 : vector<2x32xf32>
    %97 = math.tanh %96 : vector<2x32xf32>
    %cst_64 = arith.constant 1.000000e+00 : f32
    %98 = vector.broadcast %cst_64 : f32 to vector<2x32xf32>
    %99 = arith.subf %98, %89 : vector<2x32xf32>
    %100 = arith.mulf %99, %97 : vector<2x32xf32>
    %101 = arith.mulf %89, %71 : vector<2x32xf32>
    %102 = arith.addf %100, %101 : vector<2x32xf32>
    %c0_65 = arith.constant 0 : index
    %c0_66 = arith.constant 0 : index
    %103 = vector.load %arg22[%c0_65, %c0_66] : memref<2x32xf32, #tpu.memory_space<vmem>>, vector<2x32xf32>
    tpu.vector_store %arg22[%c0_65, %c0_66], %102 {strides = array<i32>} : memref<2x32xf32, #tpu.memory_space<vmem>>, vector<2x32xf32>,
    %104 = arith.index_cast %70 : i32 to index
    %c0_67 = arith.constant 0 : index
    %105 = vector.load %arg21[%104, %c0_67] : memref<16x32xf32, #tpu.memory_space<vmem>>, vector<2x32xf32>
    tpu.vector_store %arg21[%104, %c0_67], %102 {strides = array<i32>} : memref<16x32xf32, #tpu.memory_space<vmem>>, vector<2x32xf32>,
    %c2_i32_68 = arith.constant 2 : i32
    %c2_i32_69 = arith.constant 2 : i32
    %106 = arith.muli %c2_i32_68, %c2_i32_69 : i32
    %107 = tpu.assume_multiple %106, 2 : i32
    %c0_70 = arith.constant 0 : index
    %c0_71 = arith.constant 0 : index
    %108 = vector.load %arg22[%c0_70, %c0_71] : memref<2x32xf32, #tpu.memory_space<vmem>>, vector<2x32xf32>
    %109 = arith.index_cast %107 : i32 to index
    %c0_72 = arith.constant 0 : index
    %110 = vector.load %arg18[%109, %c0_72] : memref<16x32xf32, #tpu.memory_space<vmem>>, vector<2x32xf32>
    %cst_73 = arith.constant dense<0.000000e+00> : vector<2x32xf32>
    %111 = tpu.matmul %108, %28, %cst_73 {dimension_numbers = #tpu.dot_dimension_numbers<[1], [0], [0], [1], [0, 0, 1, 1], [], []>} : vector<2x32xf32>, vector<32x32xf32>, vector<2x32xf32> -> vector<2x32xf32>
    %112 = arith.addf %110, %111 : vector<2x32xf32>
    %113 = arith.negf %112 : vector<2x32xf32>
    %114 = math.exp %113 : vector<2x32xf32>
    %cst_74 = arith.constant 1.000000e+00 : f32
    %115 = vector.broadcast %cst_74 : f32 to vector<2x32xf32>
    %116 = arith.addf %115, %114 : vector<2x32xf32>
    %117 = arith.divf %115, %116 : vector<2x32xf32>
    %118 = arith.index_cast %107 : i32 to index
    %c0_75 = arith.constant 0 : index
    %119 = vector.load %arg19[%118, %c0_75] : memref<16x32xf32, #tpu.memory_space<vmem>>, vector<2x32xf32>
    %cst_76 = arith.constant dense<0.000000e+00> : vector<2x32xf32>
    %120 = tpu.matmul %108, %29, %cst_76 {dimension_numbers = #tpu.dot_dimension_numbers<[1], [0], [0], [1], [0, 0, 1, 1], [], []>} : vector<2x32xf32>, vector<32x32xf32>, vector<2x32xf32> -> vector<2x32xf32>
    %121 = arith.addf %119, %120 : vector<2x32xf32>
    %122 = arith.negf %121 : vector<2x32xf32>
    %123 = math.exp %122 : vector<2x32xf32>
    %cst_77 = arith.constant 1.000000e+00 : f32
    %124 = vector.broadcast %cst_77 : f32 to vector<2x32xf32>
    %125 = arith.addf %124, %123 : vector<2x32xf32>
    %126 = arith.divf %124, %125 : vector<2x32xf32>
    %127 = arith.index_cast %107 : i32 to index
    %c0_78 = arith.constant 0 : index
    %128 = vector.load %arg20[%127, %c0_78] : memref<16x32xf32, #tpu.memory_space<vmem>>, vector<2x32xf32>
    %cst_79 = arith.constant dense<0.000000e+00> : vector<2x32xf32>
    %129 = tpu.matmul %108, %30, %cst_79 {dimension_numbers = #tpu.dot_dimension_numbers<[1], [0], [0], [1], [0, 0, 1, 1], [], []>} : vector<2x32xf32>, vector<32x32xf32>, vector<2x32xf32> -> vector<2x32xf32>
    %130 = vector.broadcast %31 : vector<1x32xf32> to vector<2x32xf32>
    %131 = arith.addf %129, %130 : vector<2x32xf32>
    %132 = arith.mulf %117, %131 : vector<2x32xf32>
    %133 = arith.addf %128, %132 : vector<2x32xf32>
    %134 = math.tanh %133 : vector<2x32xf32>
    %cst_80 = arith.constant 1.000000e+00 : f32
    %135 = vector.broadcast %cst_80 : f32 to vector<2x32xf32>
    %136 = arith.subf %135, %126 : vector<2x32xf32>
    %137 = arith.mulf %136, %134 : vector<2x32xf32>
    %138 = arith.mulf %126, %108 : vector<2x32xf32>
    %139 = arith.addf %137, %138 : vector<2x32xf32>
    %c0_81 = arith.constant 0 : index
    %c0_82 = arith.constant 0 : index
    %140 = vector.load %arg22[%c0_81, %c0_82] : memref<2x32xf32, #tpu.memory_space<vmem>>, vector<2x32xf32>
    tpu.vector_store %arg22[%c0_81, %c0_82], %139 {strides = array<i32>} : memref<2x32xf32, #tpu.memory_space<vmem>>, vector<2x32xf32>,
    %141 = arith.index_cast %107 : i32 to index
    %c0_83 = arith.constant 0 : index
    %142 = vector.load %arg21[%141, %c0_83] : memref<16x32xf32, #tpu.memory_space<vmem>>, vector<2x32xf32>
    tpu.vector_store %arg21[%141, %c0_83], %139 {strides = array<i32>} : memref<16x32xf32, #tpu.memory_space<vmem>>, vector<2x32xf32>,
    %c3_i32 = arith.constant 3 : i32
    %c2_i32_84 = arith.constant 2 : i32
    %143 = arith.muli %c3_i32, %c2_i32_84 : i32
    %144 = tpu.assume_multiple %143, 2 : i32
    %c0_85 = arith.constant 0 : index
    %c0_86 = arith.constant 0 : index
    %145 = vector.load %arg22[%c0_85, %c0_86] : memref<2x32xf32, #tpu.memory_space<vmem>>, vector<2x32xf32>
    %146 = arith.index_cast %144 : i32 to index
    %c0_87 = arith.constant 0 : index
    %147 = vector.load %arg18[%146, %c0_87] : memref<16x32xf32, #tpu.memory_space<vmem>>, vector<2x32xf32>
    %cst_88 = arith.constant dense<0.000000e+00> : vector<2x32xf32>
    %148 = tpu.matmul %145, %28, %cst_88 {dimension_numbers = #tpu.dot_dimension_numbers<[1], [0], [0], [1], [0, 0, 1, 1], [], []>} : vector<2x32xf32>, vector<32x32xf32>, vector<2x32xf32> -> vector<2x32xf32>
    %149 = arith.addf %147, %148 : vector<2x32xf32>
    %150 = arith.negf %149 : vector<2x32xf32>
    %151 = math.exp %150 : vector<2x32xf32>
    %cst_89 = arith.constant 1.000000e+00 : f32
    %152 = vector.broadcast %cst_89 : f32 to vector<2x32xf32>
    %153 = arith.addf %152, %151 : vector<2x32xf32>
    %154 = arith.divf %152, %153 : vector<2x32xf32>
    %155 = arith.index_cast %144 : i32 to index
    %c0_90 = arith.constant 0 : index
    %156 = vector.load %arg19[%155, %c0_90] : memref<16x32xf32, #tpu.memory_space<vmem>>, vector<2x32xf32>
    %cst_91 = arith.constant dense<0.000000e+00> : vector<2x32xf32>
    %157 = tpu.matmul %145, %29, %cst_91 {dimension_numbers = #tpu.dot_dimension_numbers<[1], [0], [0], [1], [0, 0, 1, 1], [], []>} : vector<2x32xf32>, vector<32x32xf32>, vector<2x32xf32> -> vector<2x32xf32>
    %158 = arith.addf %156, %157 : vector<2x32xf32>
    %159 = arith.negf %158 : vector<2x32xf32>
    %160 = math.exp %159 : vector<2x32xf32>
    %cst_92 = arith.constant 1.000000e+00 : f32
    %161 = vector.broadcast %cst_92 : f32 to vector<2x32xf32>
    %162 = arith.addf %161, %160 : vector<2x32xf32>
    %163 = arith.divf %161, %162 : vector<2x32xf32>
    %164 = arith.index_cast %144 : i32 to index
    %c0_93 = arith.constant 0 : index
    %165 = vector.load %arg20[%164, %c0_93] : memref<16x32xf32, #tpu.memory_space<vmem>>, vector<2x32xf32>
    %cst_94 = arith.constant dense<0.000000e+00> : vector<2x32xf32>
    %166 = tpu.matmul %145, %30, %cst_94 {dimension_numbers = #tpu.dot_dimension_numbers<[1], [0], [0], [1], [0, 0, 1, 1], [], []>} : vector<2x32xf32>, vector<32x32xf32>, vector<2x32xf32> -> vector<2x32xf32>
    %167 = vector.broadcast %31 : vector<1x32xf32> to vector<2x32xf32>
    %168 = arith.addf %166, %167 : vector<2x32xf32>
    %169 = arith.mulf %154, %168 : vector<2x32xf32>
    %170 = arith.addf %165, %169 : vector<2x32xf32>
    %171 = math.tanh %170 : vector<2x32xf32>
    %cst_95 = arith.constant 1.000000e+00 : f32
    %172 = vector.broadcast %cst_95 : f32 to vector<2x32xf32>
    %173 = arith.subf %172, %163 : vector<2x32xf32>
    %174 = arith.mulf %173, %171 : vector<2x32xf32>
    %175 = arith.mulf %163, %145 : vector<2x32xf32>
    %176 = arith.addf %174, %175 : vector<2x32xf32>
    %c0_96 = arith.constant 0 : index
    %c0_97 = arith.constant 0 : index
    %177 = vector.load %arg22[%c0_96, %c0_97] : memref<2x32xf32, #tpu.memory_space<vmem>>, vector<2x32xf32>
    tpu.vector_store %arg22[%c0_96, %c0_97], %176 {strides = array<i32>} : memref<2x32xf32, #tpu.memory_space<vmem>>, vector<2x32xf32>,
    %178 = arith.index_cast %144 : i32 to index
    %c0_98 = arith.constant 0 : index
    %179 = vector.load %arg21[%178, %c0_98] : memref<16x32xf32, #tpu.memory_space<vmem>>, vector<2x32xf32>
    tpu.vector_store %arg21[%178, %c0_98], %176 {strides = array<i32>} : memref<16x32xf32, #tpu.memory_space<vmem>>, vector<2x32xf32>,
    %c4_i32 = arith.constant 4 : i32
    %c2_i32_99 = arith.constant 2 : i32
    %180 = arith.muli %c4_i32, %c2_i32_99 : i32
    %181 = tpu.assume_multiple %180, 2 : i32
    %c0_100 = arith.constant 0 : index
    %c0_101 = arith.constant 0 : index
    %182 = vector.load %arg22[%c0_100, %c0_101] : memref<2x32xf32, #tpu.memory_space<vmem>>, vector<2x32xf32>
    %183 = arith.index_cast %181 : i32 to index
    %c0_102 = arith.constant 0 : index
    %184 = vector.load %arg18[%183, %c0_102] : memref<16x32xf32, #tpu.memory_space<vmem>>, vector<2x32xf32>
    %cst_103 = arith.constant dense<0.000000e+00> : vector<2x32xf32>
    %185 = tpu.matmul %182, %28, %cst_103 {dimension_numbers = #tpu.dot_dimension_numbers<[1], [0], [0], [1], [0, 0, 1, 1], [], []>} : vector<2x32xf32>, vector<32x32xf32>, vector<2x32xf32> -> vector<2x32xf32>
    %186 = arith.addf %184, %185 : vector<2x32xf32>
    %187 = arith.negf %186 : vector<2x32xf32>
    %188 = math.exp %187 : vector<2x32xf32>
    %cst_104 = arith.constant 1.000000e+00 : f32
    %189 = vector.broadcast %cst_104 : f32 to vector<2x32xf32>
    %190 = arith.addf %189, %188 : vector<2x32xf32>
    %191 = arith.divf %189, %190 : vector<2x32xf32>
    %192 = arith.index_cast %181 : i32 to index
    %c0_105 = arith.constant 0 : index
    %193 = vector.load %arg19[%192, %c0_105] : memref<16x32xf32, #tpu.memory_space<vmem>>, vector<2x32xf32>
    %cst_106 = arith.constant dense<0.000000e+00> : vector<2x32xf32>
    %194 = tpu.matmul %182, %29, %cst_106 {dimension_numbers = #tpu.dot_dimension_numbers<[1], [0], [0], [1], [0, 0, 1, 1], [], []>} : vector<2x32xf32>, vector<32x32xf32>, vector<2x32xf32> -> vector<2x32xf32>
    %195 = arith.addf %193, %194 : vector<2x32xf32>
    %196 = arith.negf %195 : vector<2x32xf32>
    %197 = math.exp %196 : vector<2x32xf32>
    %cst_107 = arith.constant 1.000000e+00 : f32
    %198 = vector.broadcast %cst_107 : f32 to vector<2x32xf32>
    %199 = arith.addf %198, %197 : vector<2x32xf32>
    %200 = arith.divf %198, %199 : vector<2x32xf32>
    %201 = arith.index_cast %181 : i32 to index
    %c0_108 = arith.constant 0 : index
    %202 = vector.load %arg20[%201, %c0_108] : memref<16x32xf32, #tpu.memory_space<vmem>>, vector<2x32xf32>
    %cst_109 = arith.constant dense<0.000000e+00> : vector<2x32xf32>
    %203 = tpu.matmul %182, %30, %cst_109 {dimension_numbers = #tpu.dot_dimension_numbers<[1], [0], [0], [1], [0, 0, 1, 1], [], []>} : vector<2x32xf32>, vector<32x32xf32>, vector<2x32xf32> -> vector<2x32xf32>
    %204 = vector.broadcast %31 : vector<1x32xf32> to vector<2x32xf32>
    %205 = arith.addf %203, %204 : vector<2x32xf32>
    %206 = arith.mulf %191, %205 : vector<2x32xf32>
    %207 = arith.addf %202, %206 : vector<2x32xf32>
    %208 = math.tanh %207 : vector<2x32xf32>
    %cst_110 = arith.constant 1.000000e+00 : f32
    %209 = vector.broadcast %cst_110 : f32 to vector<2x32xf32>
    %210 = arith.subf %209, %200 : vector<2x32xf32>
    %211 = arith.mulf %210, %208 : vector<2x32xf32>
    %212 = arith.mulf %200, %182 : vector<2x32xf32>
    %213 = arith.addf %211, %212 : vector<2x32xf32>
    %c0_111 = arith.constant 0 : index
    %c0_112 = arith.constant 0 : index
    %214 = vector.load %arg22[%c0_111, %c0_112] : memref<2x32xf32, #tpu.memory_space<vmem>>, vector<2x32xf32>
    tpu.vector_store %arg22[%c0_111, %c0_112], %213 {strides = array<i32>} : memref<2x32xf32, #tpu.memory_space<vmem>>, vector<2x32xf32>,
    %215 = arith.index_cast %181 : i32 to index
    %c0_113 = arith.constant 0 : index
    %216 = vector.load %arg21[%215, %c0_113] : memref<16x32xf32, #tpu.memory_space<vmem>>, vector<2x32xf32>
    tpu.vector_store %arg21[%215, %c0_113], %213 {strides = array<i32>} : memref<16x32xf32, #tpu.memory_space<vmem>>, vector<2x32xf32>,
    %c5_i32 = arith.constant 5 : i32
    %c2_i32_114 = arith.constant 2 : i32
    %217 = arith.muli %c5_i32, %c2_i32_114 : i32
    %218 = tpu.assume_multiple %217, 2 : i32
    %c0_115 = arith.constant 0 : index
    %c0_116 = arith.constant 0 : index
    %219 = vector.load %arg22[%c0_115, %c0_116] : memref<2x32xf32, #tpu.memory_space<vmem>>, vector<2x32xf32>
    %220 = arith.index_cast %218 : i32 to index
    %c0_117 = arith.constant 0 : index
    %221 = vector.load %arg18[%220, %c0_117] : memref<16x32xf32, #tpu.memory_space<vmem>>, vector<2x32xf32>
    %cst_118 = arith.constant dense<0.000000e+00> : vector<2x32xf32>
    %222 = tpu.matmul %219, %28, %cst_118 {dimension_numbers = #tpu.dot_dimension_numbers<[1], [0], [0], [1], [0, 0, 1, 1], [], []>} : vector<2x32xf32>, vector<32x32xf32>, vector<2x32xf32> -> vector<2x32xf32>
    %223 = arith.addf %221, %222 : vector<2x32xf32>
    %224 = arith.negf %223 : vector<2x32xf32>
    %225 = math.exp %224 : vector<2x32xf32>
    %cst_119 = arith.constant 1.000000e+00 : f32
    %226 = vector.broadcast %cst_119 : f32 to vector<2x32xf32>
    %227 = arith.addf %226, %225 : vector<2x32xf32>
    %228 = arith.divf %226, %227 : vector<2x32xf32>
    %229 = arith.index_cast %218 : i32 to index
    %c0_120 = arith.constant 0 : index
    %230 = vector.load %arg19[%229, %c0_120] : memref<16x32xf32, #tpu.memory_space<vmem>>, vector<2x32xf32>
    %cst_121 = arith.constant dense<0.000000e+00> : vector<2x32xf32>
    %231 = tpu.matmul %219, %29, %cst_121 {dimension_numbers = #tpu.dot_dimension_numbers<[1], [0], [0], [1], [0, 0, 1, 1], [], []>} : vector<2x32xf32>, vector<32x32xf32>, vector<2x32xf32> -> vector<2x32xf32>
    %232 = arith.addf %230, %231 : vector<2x32xf32>
    %233 = arith.negf %232 : vector<2x32xf32>
    %234 = math.exp %233 : vector<2x32xf32>
    %cst_122 = arith.constant 1.000000e+00 : f32
    %235 = vector.broadcast %cst_122 : f32 to vector<2x32xf32>
    %236 = arith.addf %235, %234 : vector<2x32xf32>
    %237 = arith.divf %235, %236 : vector<2x32xf32>
    %238 = arith.index_cast %218 : i32 to index
    %c0_123 = arith.constant 0 : index
    %239 = vector.load %arg20[%238, %c0_123] : memref<16x32xf32, #tpu.memory_space<vmem>>, vector<2x32xf32>
    %cst_124 = arith.constant dense<0.000000e+00> : vector<2x32xf32>
    %240 = tpu.matmul %219, %30, %cst_124 {dimension_numbers = #tpu.dot_dimension_numbers<[1], [0], [0], [1], [0, 0, 1, 1], [], []>} : vector<2x32xf32>, vector<32x32xf32>, vector<2x32xf32> -> vector<2x32xf32>
    %241 = vector.broadcast %31 : vector<1x32xf32> to vector<2x32xf32>
    %242 = arith.addf %240, %241 : vector<2x32xf32>
    %243 = arith.mulf %228, %242 : vector<2x32xf32>
    %244 = arith.addf %239, %243 : vector<2x32xf32>
    %245 = math.tanh %244 : vector<2x32xf32>
    %cst_125 = arith.constant 1.000000e+00 : f32
    %246 = vector.broadcast %cst_125 : f32 to vector<2x32xf32>
    %247 = arith.subf %246, %237 : vector<2x32xf32>
    %248 = arith.mulf %247, %245 : vector<2x32xf32>
    %249 = arith.mulf %237, %219 : vector<2x32xf32>
    %250 = arith.addf %248, %249 : vector<2x32xf32>
    %c0_126 = arith.constant 0 : index
    %c0_127 = arith.constant 0 : index
    %251 = vector.load %arg22[%c0_126, %c0_127] : memref<2x32xf32, #tpu.memory_space<vmem>>, vector<2x32xf32>
    tpu.vector_store %arg22[%c0_126, %c0_127], %250 {strides = array<i32>} : memref<2x32xf32, #tpu.memory_space<vmem>>, vector<2x32xf32>,
    %252 = arith.index_cast %218 : i32 to index
    %c0_128 = arith.constant 0 : index
    %253 = vector.load %arg21[%252, %c0_128] : memref<16x32xf32, #tpu.memory_space<vmem>>, vector<2x32xf32>
    tpu.vector_store %arg21[%252, %c0_128], %250 {strides = array<i32>} : memref<16x32xf32, #tpu.memory_space<vmem>>, vector<2x32xf32>,
    %c6_i32 = arith.constant 6 : i32
    %c2_i32_129 = arith.constant 2 : i32
    %254 = arith.muli %c6_i32, %c2_i32_129 : i32
    %255 = tpu.assume_multiple %254, 2 : i32
    %c0_130 = arith.constant 0 : index
    %c0_131 = arith.constant 0 : index
    %256 = vector.load %arg22[%c0_130, %c0_131] : memref<2x32xf32, #tpu.memory_space<vmem>>, vector<2x32xf32>
    %257 = arith.index_cast %255 : i32 to index
    %c0_132 = arith.constant 0 : index
    %258 = vector.load %arg18[%257, %c0_132] : memref<16x32xf32, #tpu.memory_space<vmem>>, vector<2x32xf32>
    %cst_133 = arith.constant dense<0.000000e+00> : vector<2x32xf32>
    %259 = tpu.matmul %256, %28, %cst_133 {dimension_numbers = #tpu.dot_dimension_numbers<[1], [0], [0], [1], [0, 0, 1, 1], [], []>} : vector<2x32xf32>, vector<32x32xf32>, vector<2x32xf32> -> vector<2x32xf32>
    %260 = arith.addf %258, %259 : vector<2x32xf32>
    %261 = arith.negf %260 : vector<2x32xf32>
    %262 = math.exp %261 : vector<2x32xf32>
    %cst_134 = arith.constant 1.000000e+00 : f32
    %263 = vector.broadcast %cst_134 : f32 to vector<2x32xf32>
    %264 = arith.addf %263, %262 : vector<2x32xf32>
    %265 = arith.divf %263, %264 : vector<2x32xf32>
    %266 = arith.index_cast %255 : i32 to index
    %c0_135 = arith.constant 0 : index
    %267 = vector.load %arg19[%266, %c0_135] : memref<16x32xf32, #tpu.memory_space<vmem>>, vector<2x32xf32>
    %cst_136 = arith.constant dense<0.000000e+00> : vector<2x32xf32>
    %268 = tpu.matmul %256, %29, %cst_136 {dimension_numbers = #tpu.dot_dimension_numbers<[1], [0], [0], [1], [0, 0, 1, 1], [], []>} : vector<2x32xf32>, vector<32x32xf32>, vector<2x32xf32> -> vector<2x32xf32>
    %269 = arith.addf %267, %268 : vector<2x32xf32>
    %270 = arith.negf %269 : vector<2x32xf32>
    %271 = math.exp %270 : vector<2x32xf32>
    %cst_137 = arith.constant 1.000000e+00 : f32
    %272 = vector.broadcast %cst_137 : f32 to vector<2x32xf32>
    %273 = arith.addf %272, %271 : vector<2x32xf32>
    %274 = arith.divf %272, %273 : vector<2x32xf32>
    %275 = arith.index_cast %255 : i32 to index
    %c0_138 = arith.constant 0 : index
    %276 = vector.load %arg20[%275, %c0_138] : memref<16x32xf32, #tpu.memory_space<vmem>>, vector<2x32xf32>
    %cst_139 = arith.constant dense<0.000000e+00> : vector<2x32xf32>
    %277 = tpu.matmul %256, %30, %cst_139 {dimension_numbers = #tpu.dot_dimension_numbers<[1], [0], [0], [1], [0, 0, 1, 1], [], []>} : vector<2x32xf32>, vector<32x32xf32>, vector<2x32xf32> -> vector<2x32xf32>
    %278 = vector.broadcast %31 : vector<1x32xf32> to vector<2x32xf32>
    %279 = arith.addf %277, %278 : vector<2x32xf32>
    %280 = arith.mulf %265, %279 : vector<2x32xf32>
    %281 = arith.addf %276, %280 : vector<2x32xf32>
    %282 = math.tanh %281 : vector<2x32xf32>
    %cst_140 = arith.constant 1.000000e+00 : f32
    %283 = vector.broadcast %cst_140 : f32 to vector<2x32xf32>
    %284 = arith.subf %283, %274 : vector<2x32xf32>
    %285 = arith.mulf %284, %282 : vector<2x32xf32>
    %286 = arith.mulf %274, %256 : vector<2x32xf32>
    %287 = arith.addf %285, %286 : vector<2x32xf32>
    %c0_141 = arith.constant 0 : index
    %c0_142 = arith.constant 0 : index
    %288 = vector.load %arg22[%c0_141, %c0_142] : memref<2x32xf32, #tpu.memory_space<vmem>>, vector<2x32xf32>
    tpu.vector_store %arg22[%c0_141, %c0_142], %287 {strides = array<i32>} : memref<2x32xf32, #tpu.memory_space<vmem>>, vector<2x32xf32>,
    %289 = arith.index_cast %255 : i32 to index
    %c0_143 = arith.constant 0 : index
    %290 = vector.load %arg21[%289, %c0_143] : memref<16x32xf32, #tpu.memory_space<vmem>>, vector<2x32xf32>
    tpu.vector_store %arg21[%289, %c0_143], %287 {strides = array<i32>} : memref<16x32xf32, #tpu.memory_space<vmem>>, vector<2x32xf32>,
    %c7_i32 = arith.constant 7 : i32
    %c2_i32_144 = arith.constant 2 : i32
    %291 = arith.muli %c7_i32, %c2_i32_144 : i32
    %292 = tpu.assume_multiple %291, 2 : i32
    %c0_145 = arith.constant 0 : index
    %c0_146 = arith.constant 0 : index
    %293 = vector.load %arg22[%c0_145, %c0_146] : memref<2x32xf32, #tpu.memory_space<vmem>>, vector<2x32xf32>
    %294 = arith.index_cast %292 : i32 to index
    %c0_147 = arith.constant 0 : index
    %295 = vector.load %arg18[%294, %c0_147] : memref<16x32xf32, #tpu.memory_space<vmem>>, vector<2x32xf32>
    %cst_148 = arith.constant dense<0.000000e+00> : vector<2x32xf32>
    %296 = tpu.matmul %293, %28, %cst_148 {dimension_numbers = #tpu.dot_dimension_numbers<[1], [0], [0], [1], [0, 0, 1, 1], [], []>} : vector<2x32xf32>, vector<32x32xf32>, vector<2x32xf32> -> vector<2x32xf32>
    %297 = arith.addf %295, %296 : vector<2x32xf32>
    %298 = arith.negf %297 : vector<2x32xf32>
    %299 = math.exp %298 : vector<2x32xf32>
    %cst_149 = arith.constant 1.000000e+00 : f32
    %300 = vector.broadcast %cst_149 : f32 to vector<2x32xf32>
    %301 = arith.addf %300, %299 : vector<2x32xf32>
    %302 = arith.divf %300, %301 : vector<2x32xf32>
    %303 = arith.index_cast %292 : i32 to index
    %c0_150 = arith.constant 0 : index
    %304 = vector.load %arg19[%303, %c0_150] : memref<16x32xf32, #tpu.memory_space<vmem>>, vector<2x32xf32>
    %cst_151 = arith.constant dense<0.000000e+00> : vector<2x32xf32>
    %305 = tpu.matmul %293, %29, %cst_151 {dimension_numbers = #tpu.dot_dimension_numbers<[1], [0], [0], [1], [0, 0, 1, 1], [], []>} : vector<2x32xf32>, vector<32x32xf32>, vector<2x32xf32> -> vector<2x32xf32>
    %306 = arith.addf %304, %305 : vector<2x32xf32>
    %307 = arith.negf %306 : vector<2x32xf32>
    %308 = math.exp %307 : vector<2x32xf32>
    %cst_152 = arith.constant 1.000000e+00 : f32
    %309 = vector.broadcast %cst_152 : f32 to vector<2x32xf32>
    %310 = arith.addf %309, %308 : vector<2x32xf32>
    %311 = arith.divf %309, %310 : vector<2x32xf32>
    %312 = arith.index_cast %292 : i32 to index
    %c0_153 = arith.constant 0 : index
    %313 = vector.load %arg20[%312, %c0_153] : memref<16x32xf32, #tpu.memory_space<vmem>>, vector<2x32xf32>
    %cst_154 = arith.constant dense<0.000000e+00> : vector<2x32xf32>
    %314 = tpu.matmul %293, %30, %cst_154 {dimension_numbers = #tpu.dot_dimension_numbers<[1], [0], [0], [1], [0, 0, 1, 1], [], []>} : vector<2x32xf32>, vector<32x32xf32>, vector<2x32xf32> -> vector<2x32xf32>
    %315 = vector.broadcast %31 : vector<1x32xf32> to vector<2x32xf32>
    %316 = arith.addf %314, %315 : vector<2x32xf32>
    %317 = arith.mulf %302, %316 : vector<2x32xf32>
    %318 = arith.addf %313, %317 : vector<2x32xf32>
    %319 = math.tanh %318 : vector<2x32xf32>
    %cst_155 = arith.constant 1.000000e+00 : f32
    %320 = vector.broadcast %cst_155 : f32 to vector<2x32xf32>
    %321 = arith.subf %320, %311 : vector<2x32xf32>
    %322 = arith.mulf %321, %319 : vector<2x32xf32>
    %323 = arith.mulf %311, %293 : vector<2x32xf32>
    %324 = arith.addf %322, %323 : vector<2x32xf32>
    %c0_156 = arith.constant 0 : index
    %c0_157 = arith.constant 0 : index
    %325 = vector.load %arg22[%c0_156, %c0_157] : memref<2x32xf32, #tpu.memory_space<vmem>>, vector<2x32xf32>
    tpu.vector_store %arg22[%c0_156, %c0_157], %324 {strides = array<i32>} : memref<2x32xf32, #tpu.memory_space<vmem>>, vector<2x32xf32>,
    %326 = arith.index_cast %292 : i32 to index
    %c0_158 = arith.constant 0 : index
    %327 = vector.load %arg21[%326, %c0_158] : memref<16x32xf32, #tpu.memory_space<vmem>>, vector<2x32xf32>
    tpu.vector_store %arg21[%326, %c0_158], %324 {strides = array<i32>} : memref<16x32xf32, #tpu.memory_space<vmem>>, vector<2x32xf32>,
    %c8_i32 = arith.constant 8 : i32
    %c0_159 = arith.constant 0 : index
    %c0_160 = arith.constant 0 : index
    %328 = vector.load %arg21[%c0_159, %c0_160] : memref<16x32xf32, #tpu.memory_space<vmem>>, vector<16x32xf32>
    %c0_161 = arith.constant 0 : index
    %c0_162 = arith.constant 0 : index
    %329 = vector.load %arg14[%c0_161, %c0_162] : memref<32x6xf32, #tpu.memory_space<vmem>>, vector<32x6xf32>
    %cst_163 = arith.constant dense<0.000000e+00> : vector<16x6xf32>
    %330 = tpu.matmul %328, %329, %cst_163 {dimension_numbers = #tpu.dot_dimension_numbers<[1], [0], [0], [1], [0, 0, 1, 1], [], []>} : vector<16x32xf32>, vector<32x6xf32>, vector<16x6xf32> -> vector<16x6xf32>
    %c0_164 = arith.constant 0 : index
    %c0_165 = arith.constant 0 : index
    %331 = vector.load %arg15[%c0_164, %c0_165] : memref<1x6xf32, #tpu.memory_space<vmem>>, vector<1x6xf32>
    %332 = vector.broadcast %331 : vector<1x6xf32> to vector<16x6xf32>
    %333 = arith.addf %330, %332 : vector<16x6xf32>
    %c0_166 = arith.constant 0 : index
    %c0_167 = arith.constant 0 : index
    %334 = vector.load %arg16[%c0_166, %c0_167] : memref<16x6xf32, #tpu.memory_space<vmem>>, vector<16x6xf32>
    tpu.vector_store %arg16[%c0_166, %c0_167], %333 {strides = array<i32>} : memref<16x6xf32, #tpu.memory_space<vmem>>, vector<16x6xf32>,
    %c0_168 = arith.constant 0 : index
    %c0_169 = arith.constant 0 : index
    %335 = vector.load %arg22[%c0_168, %c0_169] : memref<2x32xf32, #tpu.memory_space<vmem>>, vector<2x32xf32>
    %c0_170 = arith.constant 0 : index
    %c0_171 = arith.constant 0 : index
    %336 = vector.load %arg17[%c0_170, %c0_171] : memref<2x32xf32, #tpu.memory_space<vmem>>, vector<2x32xf32>
    tpu.vector_store %arg17[%c0_170, %c0_171], %335 {strides = array<i32>} : memref<2x32xf32, #tpu.memory_space<vmem>>, vector<2x32xf32>,
    return
  }
}

</mosaic_0001>

<bundles_post_ra>
// kernel: rnn_agent_emc_forward.1
= control target key start
LH: loop header
LB: loop body
LE: loop exit
PB: predicated region body
PF: predicated region fallthrough
CT: control target
= control target key end

     0   :  { %s2130_s0 = inlined_call_operand.vmem [shape: f32[16,24], index: 0, kind: input, shape index: {}]   ;;  %s2131_s1 = inlined_call_operand.vmem [shape: f32[2,32], index: 1, kind: input, shape index: {}]   ;;  %s2132_s2 = inlined_call_operand.hbm [shape: f32[24,32], index: 2, kind: input, shape index: {}]   ;;  %s2133_s3 = inlined_call_operand.vmem [shape: f32[1,32], index: 3, kind: input, shape index: {}]   ;;  %s2134_s4 = inlined_call_operand.hbm [shape: f32[32,32], index: 4, kind: input, shape index: {}]   ;;  %s2135_s5 = inlined_call_operand.hbm [shape: f32[32,32], index: 5, kind: input, shape index: {}]   ;;  %s2136_s6 = inlined_call_operand.hbm [shape: f32[32,32], index: 6, kind: input, shape index: {}]   ;;  %s2137_s7 = inlined_call_operand.hbm [shape: f32[32,32], index: 7, kind: input, shape index: {}]   ;;  %s2138_s8 = inlined_call_operand.hbm [shape: f32[32,32], index: 8, kind: input, shape index: {}]   ;;  %s2139_s9 = inlined_call_operand.hbm [shape: f32[32,32], index: 9, kind: input, shape index: {}]   ;;  %s2140_s10 = inlined_call_operand.vmem [shape: f32[1,32], index: 10, kind: input, shape index: {}]   ;;  %s2141_s11 = inlined_call_operand.vmem [shape: f32[1,32], index: 11, kind: input, shape index: {}]   ;;  %s2142_s12 = inlined_call_operand.vmem [shape: f32[1,32], index: 12, kind: input, shape index: {}]   ;;  %s2143_s13 = inlined_call_operand.vmem [shape: f32[1,32], index: 13, kind: input, shape index: {}]   ;;  %s2144_s14 = inlined_call_operand.vmem [shape: f32[32,6], index: 14, kind: input, shape index: {}]   ;;  %s2145_s15 = inlined_call_operand.vmem [shape: f32[1,6], index: 15, kind: input, shape index: {}]   ;;  %s2146_s16 = inlined_call_operand.vmem [shape: f32[16,6], index: 16, kind: output, shape index: {0}]   ;;  %s2147_s17 = inlined_call_operand.hbm [shape: f32[2,32], index: 17, kind: output, shape index: {1}]  }
   0x1   :  { %2149 = sst [smem:[#allocation25_spill]] %s2130_s0 }
   0x2   :  { %2150 = sst [smem:[#allocation26_spill]] %s2131_s1 }
   0x3   :  { %23 = vsyncpa [#allocation8], 0 }
   0x4   :  { %24 = vsyncpa [#allocation11], 0 }
   0x5   :  { %25 = vsyncpa [#allocation14], 0 }
   0x6   :  { %26 = vsyncpa [#allocation17], 0 }
   0x7   :  { %27 = vsyncpa [#allocation9], 0  ;;  %s51_s26 = sshll.u32 %s2134_s4, 4  ;;  %s1706_s27 = smov [#allocation10]   ;;  %s52_s26 = int_to_ptr.hbm [resolvable:$true] %s51_s26 }
   0x8   :  { %s53_s28 = sshll.u32 %s1706_s27, 4  ;;  %s77_s30 = sshll.u32 %s2136_s6, 4  ;;  %s54_s28 = int_to_ptr.vmem [resolvable:$true] %s53_s28  ;;  %s78_s30 = int_to_ptr.hbm [resolvable:$true] %s77_s30 }
   0x9   :  { %s1707_s18 = smov 128   ;;  %s1708_s19 = smov 8  }
   0xa   :  { %59 = dma.hbm_to_vmem [thread:$0]  %s52_s26, 512, %s54_s28, [#allocation11], %s1707_s18, %s1707_s18, %s1708_s19  }
   0xb   :  { %s1709_s1 = smov [#allocation13]   ;;  %s103_s4 = sshll.u32 %s2138_s8, 4  ;;  %s104_s4 = int_to_ptr.hbm [resolvable:$true] %s103_s4 }
   0xc   :  { %s79_s20 = sshll.u32 %s1709_s1, 4  ;;  %s36_s24 = sshll.u32 %s2132_s2, 4  ;;  %s80_s20 = int_to_ptr.vmem [resolvable:$true] %s79_s20  ;;  %s37_s24 = int_to_ptr.hbm [resolvable:$true] %s36_s24 }
   0xd   :  { %85 = dma.hbm_to_vmem [thread:$0]  %s78_s30, 512, %s80_s20, [#allocation14], %s1707_s18, %s1707_s18, %s1708_s19  }
   0xe   :  { %s1710_s25 = smov [#allocation16]   ;;  %s1711_s26 = smov [#allocation7]  }
   0xf   :  { %s105_s27 = sshll.u32 %s1710_s25, 4  ;;  %s38_s8 = sshll.u32 %s1711_s26, 4  ;;  %s106_s27 = int_to_ptr.vmem [resolvable:$true] %s105_s27  ;;  %s39_s8 = int_to_ptr.vmem [resolvable:$true] %s38_s8 }
  0x10   :  { %111 = dma.hbm_to_vmem [thread:$0]  %s104_s4, 512, %s106_s27, [#allocation17], %s1707_s18, %s1707_s18, %s1708_s19  }
  0x11   :  { %s64_s0 = sshll.u32 %s2135_s5, 4  ;;  %s90_s1 = sshll.u32 %s2137_s7, 4  ;;  %s65_s0 = int_to_ptr.hbm [resolvable:$true] %s64_s0  ;;  %s91_s1 = int_to_ptr.hbm [resolvable:$true] %s90_s1 }
  0x12   :  { %44 = dma.hbm_to_vmem [thread:$0]  %s37_s24, 384, %s39_s8, [#allocation8], %s1707_s18, %s1707_s18, %s1708_s19  }
  0x13   :  { %s1712_s20 = smov [#allocation12]   ;;  %s1713_s22 = smov [#allocation15]  }
  0x14   :  { %s66_s21 = sshll.u32 %s1712_s20, 4  ;;  %s92_s5 = sshll.u32 %s1713_s22, 4  ;;  %s67_s21 = int_to_ptr.vmem [resolvable:$true] %s66_s21  ;;  %s93_s5 = int_to_ptr.vmem [resolvable:$true] %s92_s5 }
  0x15   :  { %72 = dma.hbm_to_vmem [thread:$0]  %s65_s0, 512, %s67_s21, [#allocation11], %s1707_s18, %s1707_s18, %s1708_s19  }
  0x16   :  { %s116_s23 = sshll.u32 %s2139_s9, 4  ;;  %s1714_s7 = smov [#allocation18]   ;;  %s117_s23 = int_to_ptr.hbm [resolvable:$true] %s116_s23 }
  0x17   :  { %98 = dma.hbm_to_vmem [thread:$0]  %s91_s1, 512, %s93_s5, [#allocation14], %s1707_s18, %s1707_s18, %s1708_s19  }
  0x18   :  { %s118_s24 = sshll.u32 %s1714_s7, 4  ;;  %s119_s24 = int_to_ptr.vmem [resolvable:$true] %s118_s24 }
  0x19   :  { %124 = dma.hbm_to_vmem [thread:$0]  %s117_s23, 512, %s119_s24, [#allocation17], %s1707_s18, %s1707_s18, %s1708_s19  }
  0x1a   :  { %1696 = dma.done.wait [#allocation8], 384  }
  0x1b   :  { %1697 = vsyncadd [#allocation8], 4294966912 }
  0x1c   :  { %1698 = dma.done.wait [#allocation11], 1024  }
  0x1d   :  { %1699 = vsyncadd [#allocation11], 4294966272 }
  0x1e   :  { %1700 = dma.done.wait [#allocation14], 1024  }
  0x1f   :  { %1701 = vsyncadd [#allocation14], 4294966272 }
  0x20   :  { %1702 = dma.done.wait [#allocation17], 1024  }
  0x21   :  { %1703 = vsyncadd [#allocation17], 4294966272  ;;  %v169_v0 = vld [vmem:[#allocation7 + $0x10] sm:$0xff]  ;;  %v168_v1 = vld [vmem:[#allocation7 + $0x8] sm:$0xff]  ;;  %s2151_s27 = sld [smem:[#allocation25_spill]]  ;;  %vm174_vm0 = vcmask 195584  }
  0x22   :  { %194 = vmatpush.msra.mxu0 %v169_v0  ;;  %v167_v2 = vld [vmem:[#allocation7] sm:$0xff]  ;;  %1405 = vmatpush.msra.mxu1 %v169_v0  ;;  %v249_v5 = vld [vmem:[#allocation12 + $0x18] sm:$0xff]  ;;  %v208_v8 = vld [vmem:[#allocation10 + $0x10] sm:$0xff]  ;;  %s2152_s28 = sld [smem:[#allocation26_spill]]  ;;  %vm313_vm1 = vcmask 254976   ;;  %vm214_vm2 = vcmask 261120  }
  0x23   :  { %v282_v6 = vld [vmem:[#allocation13 + $0x18] sm:$0xff]  ;;  %266 = vmatpush.msra.mxu2 %v249_v5  ;;  %v248_v9 = vld [vmem:[#allocation12 + $0x10] sm:$0xff]  ;;  %v207_v11 = vld [vmem:[#allocation10 + $0x8] sm:$0xff]  ;;  %s1340_s18 = sshll.u32 %s2147_s17, 4  ;;  %s1341_s18 = int_to_ptr.hbm [resolvable:$true] %s1340_s18 }
  0x24   :  { %195 = vmatpush.msra.mxu0 %v168_v1  ;;  %1406 = vmatpush.msra.mxu1 %v168_v1  ;;  %v209_v7 = vld [vmem:[#allocation10 + $0x18] sm:$0xff]  ;;  %v281_v10 = vld [vmem:[#allocation13 + $0x10] sm:$0xff]  ;;  %v247_v12 = vld [vmem:[#allocation12 + $0x8] sm:$0xff] }
  0x25   :  { %299 = vmatpush.msra.mxu3 %v282_v6  ;;  %267 = vmatpush.msra.mxu2 %v248_v9  ;;  %v280_v13 = vld [vmem:[#allocation13 + $0x8] sm:$0xff]  ;;  %v206_v14 = vld [vmem:[#allocation10] sm:$0xff]  ;;  %v1854_v17 = vld [vmem:[#allocation15 + $0x18] sm:$0xff] }
  0x26   :  { %196 = vmatpush.msra.mxu0 %v167_v2  ;;  %1407 = vmatpush.msra.mxu1 %v167_v2  ;;  %v246_v15 = vld [vmem:[#allocation12] sm:$0xff]  ;;  %v1856_v18 = vld [vmem:[#allocation16 + $0x18] sm:$0xff]  ;;  %v1858_v19 = vld [vmem:[#allocation15 + $0x10] sm:$0xff] }
  0x27   :  { %v165_v3 = vld [vmem:[%s2151_s27] sm:$0xff]  ;;  %v166_v4 = vld [vmem:[%s2151_s27 + $0x8] sm:$0xff]  ;;  %300 = vmatpush.msra.mxu3 %v281_v10  ;;  %268 = vmatpush.msra.mxu2 %v247_v12  ;;  %v1893_v27 = vld [vmem:[#allocation18 + $0x18] sm:$0xff] }
  0x28   :  { %1355 = vmatmul.msk.f32.vlgmr.msra.gmra.mxu0 %vm174_vm0, %v165_v3  ;;  %1356 = vmatmul.msk.f32.vlgmr.msra.gmra.mxu1 %vm174_vm0, %v166_v4  ;;  %v279_v16 = vld [vmem:[#allocation13] sm:$0xff]  ;;  %v1862_v20 = vld [vmem:[#allocation16 + $0x10] sm:$0xff]  ;;  %v1867_v22 = vld [vmem:[#allocation15 + $0x8] sm:$0xff] }
  0x29   :  { %233 = vmatpush.msrb.mxu1 %v209_v7  ;;  %301 = vmatpush.msra.mxu3 %v280_v13  ;;  %v312_v21 = vld [vmem:[%s2152_s28] sm:$0x3]  ;;  %v1879_v24 = vld [vmem:[#allocation16 + $0x8] sm:$0xff]  ;;  %v1895_v28 = vld [vmem:[#allocation18 + $0x10] sm:$0xff] }
  0x2a   :  { %269 = vmatpush.msra.mxu2 %v246_v15  ;;  %345 = vmatpush.msrb.mxu0 %v1854_v17  ;;  %314 = vst.msk [vmem:[#allocation6] sm:$0x3] %vm313_vm1, %v312_v21  ;;  %v1876_v23 = vld [vmem:[#allocation15] sm:$0xff]  ;;  %v1900_v29 = vld [vmem:[#allocation18 + $0x8] sm:$0xff] }
  0x2b   :  { %234 = vmatpush.msrb.mxu1 %v208_v8  ;;  %302 = vmatpush.msra.mxu3 %v279_v16  ;;  %v1881_v25 = vld [vmem:[#allocation16] sm:$0xff] }
  0x2c   :  { %346 = vmatpush.msrb.mxu0 %v1858_v19  ;;  %430 = vmatpush.msrb.mxu2 %v1893_v27  ;;  %v1904_v30 = vld [vmem:[#allocation18] sm:$0xff] }
  0x2d   :  { %235 = vmatpush.msrb.mxu1 %v207_v11  ;;  %465 = vmatpush.msrb.mxu3 %v1854_v17  ;;  %v1418_v31 = vld [vmem:[%s2133_s3] ss:$0 sm:$0xff] }
  0x2e   :  { %347 = vmatpush.msrb.mxu0 %v1867_v22  ;;  %431 = vmatpush.msrb.mxu2 %v1895_v28  ;;  %v1419_v38 = vld [vmem:[%s2140_s10] ss:$0 sm:$0xff] }
  0x2f   :  { %236 = vmatpush.msrb.mxu1 %v206_v14  ;;  %466 = vmatpush.msrb.mxu3 %v1858_v19  ;;  %v1420_v41 = vld [vmem:[%s2141_s11] ss:$0 sm:$0xff] }
  0x30   :  { %348 = vmatpush.msrb.mxu0 %v1876_v23  ;;  %432 = vmatpush.msrb.mxu2 %v1900_v29  ;;  %v1421_v42 = vld [vmem:[%s2142_s12] ss:$0 sm:$0xff] }
  0x31   :  { %386 = vmatpush.msra.mxu1 %v1856_v18  ;;  %467 = vmatpush.msrb.mxu3 %v1867_v22  ;;  %v1884_v26 = vld [vmem:[#allocation6] sm:$0x3] }
  0x32   :  { %507 = vmatpush.msra.mxu0 %v1856_v18  ;;  %433 = vmatpush.msrb.mxu2 %v1904_v30  ;;  %v1961_v4 = vld [vmem:[%s2143_s13] ss:$0 sm:$0xff] }
  0x33   :  { %387 = vmatpush.msra.mxu1 %v1862_v20  ;;  %468 = vmatpush.msrb.mxu3 %v1876_v23 }
  0x34   :  { %1363 = vmatmul.msk.f32.vlgmr.msrb.gmra.mxu0 %vm214_vm2, %v1884_v26 }
  0x35   :  { %388 = vmatpush.msra.mxu1 %v1879_v24  ;;  %508 = vmatpush.msra.mxu0 %v1862_v20 }
  0x37   :  { %389 = vmatpush.msra.mxu1 %v1881_v25  ;;  %509 = vmatpush.msra.mxu0 %v1879_v24 }
  0x39   :  { %510 = vmatpush.msra.mxu0 %v1881_v25 }
  0x3b   :  { %669 = vmatpush.msrb.mxu0 %v1893_v27 }
  0x3d   :  { %670 = vmatpush.msrb.mxu0 %v1895_v28 }
  0x3f   :  { %671 = vmatpush.msrb.mxu0 %v1900_v29 }
  0x41   :  { %672 = vmatpush.msrb.mxu0 %v1904_v30 }
  0xa5   :  { %v198_v32 = vpop.f32.mrf.mxu0  ;;  %v201_v34 = vpop.f32.mrf.mxu1 }
  0xa6   :  { %v199_v33 = vadd.f32 %v1418_v31, %v198_v32  ;;  %v202_v36 = vadd.f32 %v1418_v31, %v201_v34 }
  0xa8   :  { %v204_v35 = vmax.f32 %v199_v33, 0.0  ;;  %v205_v37 = vmax.f32 %v202_v36, 0.0 }
  0xaa   :  { %1357 = vmatmul.msk.f32.vlgmr.msrb.gmra.mxu1 %vm214_vm2, %v204_v35  ;;  %1359 = vmatmul.msk.f32.vlgmr.msra.gmra.mxu2 %vm214_vm2, %v204_v35 }
  0xab   :  { %1361 = vmatmul.msk.f32.vlgmr.msra.gmra.mxu3 %vm214_vm2, %v204_v35  ;;  %549 = vmatpush.msrb.mxu1 %v1893_v27 }
  0xac   :  { %585 = vmatpush.msra.mxu2 %v1854_v17  ;;  %627 = vmatpush.msra.mxu3 %v1856_v18 }
  0xad   :  { %550 = vmatpush.msrb.mxu1 %v1895_v28 }
  0xae   :  { %586 = vmatpush.msra.mxu2 %v1858_v19  ;;  %628 = vmatpush.msra.mxu3 %v1862_v20 }
  0xaf   :  { %551 = vmatpush.msrb.mxu1 %v1900_v29 }
  0xb0   :  { %587 = vmatpush.msra.mxu2 %v1867_v22  ;;  %629 = vmatpush.msra.mxu3 %v1879_v24 }
  0xb1   :  { %552 = vmatpush.msrb.mxu1 %v1904_v30  ;;  %v350_v48 = vpop.f32.mrf.mxu0 }
  0xb2   :  { %1358 = vmatmul.msk.f32.gmra.mxu1 %vm214_vm2, %v205_v37  ;;  %1360 = vmatmul.msk.f32.gmra.mxu2 %vm214_vm2, %v205_v37 }
  0xb3   :  { %1362 = vmatmul.msk.f32.gmra.mxu3 %vm214_vm2, %v205_v37  ;;  %588 = vmatpush.msra.mxu2 %v1876_v23 }
  0xb4   :  { %630 = vmatpush.msra.mxu3 %v1881_v25 }
  0xba   :  { %1365 = vmatmul.msk.f32.vlgmr.msra.gmra.mxu1 %vm214_vm2, %v1884_v26  ;;  %1367 = vmatmul.msk.f32.vlgmr.msrb.gmra.mxu2 %vm214_vm2, %v1884_v26 }
  0xbb   :  { %705 = vmatpush.msra.mxu1 %v1854_v17  ;;  %747 = vmatpush.msrb.mxu2 %v1856_v18 }
  0xbd   :  { %706 = vmatpush.msra.mxu1 %v1858_v19  ;;  %748 = vmatpush.msrb.mxu2 %v1862_v20 }
  0xbf   :  { %707 = vmatpush.msra.mxu1 %v1867_v22  ;;  %749 = vmatpush.msrb.mxu2 %v1879_v24 }
  0xc1   :  { %708 = vmatpush.msra.mxu1 %v1876_v23  ;;  %750 = vmatpush.msrb.mxu2 %v1881_v25 }
 0x127   :  { %v238_v39 = vpop.f32.mrf.mxu1 }
 0x128   :  { %v239_v40 = vadd.f32 %v1419_v38, %v238_v39 }
 0x12a   :  { %244 = vst.msk [vmem:[#allocation2] sm:$0xff] %vm214_vm2, %v239_v40 }
 0x12d   :  { %v271_v43 = vpop.f32.mrf.mxu2 }
 0x12e   :  { %v272_v44 = vadd.f32 %v1420_v41, %v271_v43  ;;  %v304_v45 = vpop.f32.mrf.mxu3 }
 0x12f   :  { %v305_v46 = vadd.f32 %v1421_v42, %v304_v45  ;;  %v241_v47 = vpop.f32.mrf.mxu1 }
 0x130   :  { %277 = vst.msk [vmem:[#allocation3] sm:$0xff] %vm214_vm2, %v272_v44  ;;  %v242_v49 = vadd.f32 %v1419_v38, %v241_v47 }
 0x131   :  { %310 = vst.msk [vmem:[#allocation4] sm:$0xff] %vm214_vm2, %v305_v46  ;;  %v329_v50 = vld [vmem:[#allocation2] sm:$0x3] }
 0x132   :  { %245 = vst.msk [vmem:[#allocation2 + $0x8] sm:$0xff] %vm214_vm2, %v242_v49  ;;  %v353_v51 = vadd.f32 %v350_v48, %v329_v50  ;;  %v449_v49 = vld [vmem:[#allocation2 + $0x2] sm:$0x3] }
 0x134   :  { %v1364_v52 = vmul.f32 -1.442695, %v353_v51 }
 0x135   :  { %v274_v53 = vpop.f32.mrf.mxu2 }
 0x136   :  { %1424 = vpow2.f32 %v1364_v52  ;;  %v275_v54 = vadd.f32 %v1420_v41, %v274_v53  ;;  %v307_v55 = vpop.f32.mrf.mxu3 }
 0x137   :  { %v373_v56 = vld [vmem:[#allocation3] sm:$0x3]  ;;  %v391_v57 = vpop.f32.mrf.mxu1  ;;  %v308_v58 = vadd.f32 %v1421_v42, %v307_v55 }
 0x138   :  { %v394_v59 = vadd.f32 %v391_v57, %v373_v56  ;;  %278 = vst.msk [vmem:[#allocation3 + $0x8] sm:$0xff] %vm214_vm2, %v275_v54  ;;  %v414_v34 = vld [vmem:[#allocation4] sm:$0x3] }
 0x139   :  { %311 = vst.msk [vmem:[#allocation4 + $0x8] sm:$0xff] %vm214_vm2, %v308_v58 }
 0x13a   :  { %v1366_v60 = vmul.f32 -1.442695, %v394_v59 }
 0x13c   :  { %v1425_v61 = vpop.eup %1424  ;;  %1426 = vpow2.f32 %v1366_v60 }
 0x13d   :  { %v357_v62 = vadd.f32 1.0, %v1425_v61  ;;  %v435_v6 = vpop.f32.mrf.mxu2 }
 0x13e   :  { %v436_v12 = vadd.f32 %v1961_v4, %v435_v6 }
 0x13f   :  { %1428 = vrcp.f32 %v357_v62  ;;  %v369_v5 = vand.u32 2147483648, %v357_v62  ;;  %v367_v8 = vand.u32 2147483647, %v357_v62  ;;  %vm363_vm4 = vweird.f32 %v357_v62 }
 0x141   :  { %v370_v13 = vor.u32 1.1754944e-38, %v369_v5  ;;  %vm368_vm6 = vcmp.eq.f32.partialorder %v367_v8, 8.507059e+37 }
 0x142   :  { %v1427_v63 = vpop.eup %1426 }
 0x143   :  { %v398_v0 = vadd.f32 1.0, %v1427_v63 }
 0x145   :  { %v1429_v1 = vpop.eup %1428  ;;  %1430 = vrcp.f32 %v398_v0  ;;  %v410_v31 = vand.u32 2147483648, %v398_v0  ;;  %v408_v33 = vand.u32 2147483647, %v398_v0  ;;  %vm404_vm8 = vweird.f32 %v398_v0 }
 0x146   :  { %v359_v2 = vmul.f32 %v1429_v1, %v357_v62  ;;  %vm364_vm3 = vweird.f32 %v1429_v1 }
 0x147   :  { %vm365_vm5 = vmor %vm363_vm4, %vm364_vm3  ;;  %v411_v37 = vor.u32 1.1754944e-38, %v410_v31  ;;  %vm409_vm10 = vcmp.eq.f32.partialorder %v408_v33, 8.507059e+37 }
 0x148   :  { %v360_v3 = vsub.f32 1.0, %v359_v2 }
 0x14a   :  { %v361_v7 = vmul.f32 %v1429_v1, %v360_v3 }
 0x14b   :  { %v1431_v9 = vpop.eup %1430 }
 0x14c   :  { %v400_v10 = vmul.f32 %v1431_v9, %v398_v0  ;;  %v362_v11 = vadd.f32 %v1429_v1, %v361_v7  ;;  %vm405_vm7 = vweird.f32 %v1431_v9 }
 0x14d   :  { %vm406_vm9 = vmor %vm404_vm8, %vm405_vm7 }
 0x14e   :  { %v401_v14 = vsub.f32 1.0, %v400_v10  ;;  %v366_v15 = vsel %vm365_vm5, %v1429_v1, %v362_v11 }
 0x14f   :  { %v371_v16 = vsel %vm368_vm6, %v370_v13, %v366_v15 }
 0x150   :  { %v402_v21 = vmul.f32 %v1431_v9, %v401_v14  ;;  %v438_v32 = vmul.f32 %v436_v12, %v371_v16  ;;  %v536_v14 = vld [vmem:[#allocation4 + $0x2] sm:$0x3] }
 0x152   :  { %v403_v35 = vadd.f32 %v1431_v9, %v402_v21  ;;  %v439_v36 = vadd.f32 %v438_v32, %v414_v34 }
 0x154   :  { %v407_v38 = vsel %vm406_vm9, %v1431_v9, %v403_v35  ;;  %1432 = vtanh.f32 %v439_v36 }
 0x155   :  { %v412_v39 = vsel %vm409_vm10, %v411_v37, %v407_v38  ;;  %v569_v38 = vld [vmem:[#allocation2 + $0x4] sm:$0x3] }
 0x156   :  { %v441_v40 = vsub.f32 1.0, %v412_v39  ;;  %v443_v43 = vmul.f32 %v412_v39, %v1884_v26  ;;  %v494_v26 = vld [vmem:[#allocation3 + $0x2] sm:$0x3] }
 0x15a   :  { %v1433_v41 = vpop.eup %1432 }
 0x15b   :  { %v442_v42 = vmul.f32 %v1433_v41, %v441_v40  ;;  %v614_v40 = vld [vmem:[#allocation3 + $0x4] sm:$0x3] }
 0x15d   :  { %v444_v44 = vadd.f32 %v443_v43, %v442_v42 }
 0x15f   :  { %445 = vst.msk [vmem:[#allocation6] sm:$0x3] %vm313_vm1, %v444_v44 }
 0x160   :  { %446 = vst.msk [vmem:[#allocation5] sm:$0x3] %vm313_vm1, %v444_v44 }
 0x166   :  { %v1967_v45 = vld [vmem:[#allocation6] sm:$0x3] }
 0x167   :  { %1368 = vmatmul.msk.f32.vlgmr.msrb.gmra.mxu3 %vm214_vm2, %v1967_v45  ;;  %1370 = vmatmul.msk.f32.vlgmr.msra.gmra.mxu0 %vm214_vm2, %v1967_v45 }
 0x168   :  { %1372 = vmatmul.msk.f32.vlgmr.msrb.gmra.mxu1 %vm214_vm2, %v1967_v45  ;;  %789 = vmatpush.msrb.mxu3 %v1893_v27 }
 0x169   :  { %825 = vmatpush.msra.mxu0 %v1854_v17  ;;  %867 = vmatpush.msrb.mxu1 %v1856_v18 }
 0x16a   :  { %790 = vmatpush.msrb.mxu3 %v1895_v28 }
 0x16b   :  { %826 = vmatpush.msra.mxu0 %v1858_v19  ;;  %868 = vmatpush.msrb.mxu1 %v1862_v20 }
 0x16c   :  { %791 = vmatpush.msrb.mxu3 %v1900_v29 }
 0x16d   :  { %827 = vmatpush.msra.mxu0 %v1867_v22  ;;  %869 = vmatpush.msrb.mxu1 %v1879_v24 }
 0x16e   :  { %792 = vmatpush.msrb.mxu3 %v1904_v30 }
 0x16f   :  { %828 = vmatpush.msra.mxu0 %v1876_v23  ;;  %870 = vmatpush.msrb.mxu1 %v1881_v25 }
 0x1e4   :  { %v512_v46 = vpop.f32.mrf.mxu0 }
 0x1e5   :  { %v515_v47 = vadd.f32 %v512_v46, %v494_v26  ;;  %v554_v3 = vpop.f32.mrf.mxu1 }
 0x1e6   :  { %v555_v7 = vadd.f32 %v1961_v4, %v554_v3 }
 0x1e7   :  { %v1371_v48 = vmul.f32 -1.442695, %v515_v47 }
 0x1e9   :  { %1434 = vpow2.f32 %v1371_v48 }
 0x1ea   :  { %v470_v50 = vpop.f32.mrf.mxu3 }
 0x1eb   :  { %v473_v51 = vadd.f32 %v470_v50, %v449_v49 }
 0x1ed   :  { %v1369_v52 = vmul.f32 -1.442695, %v473_v51 }
 0x1ef   :  { %v1435_v53 = vpop.eup %1434  ;;  %1436 = vpow2.f32 %v1369_v52 }
 0x1f0   :  { %v519_v54 = vadd.f32 1.0, %v1435_v53 }
 0x1f2   :  { %1438 = vrcp.f32 %v519_v54  ;;  %v531_v11 = vand.u32 2147483648, %v519_v54  ;;  %vm525_vm0 = vweird.f32 %v519_v54  ;;  %v529_v13 = vand.u32 2147483647, %v519_v54 }
 0x1f4   :  { %v532_v21 = vor.u32 1.1754944e-38, %v531_v11  ;;  %vm530_vm4 = vcmp.eq.f32.partialorder %v529_v13, 8.507059e+37 }
 0x1f5   :  { %v1437_v55 = vpop.eup %1436 }
 0x1f6   :  { %v477_v56 = vadd.f32 1.0, %v1437_v55 }
 0x1f8   :  { %1440 = vrcp.f32 %v477_v56  ;;  %v1439_v57 = vpop.eup %1438  ;;  %v489_v63 = vand.u32 2147483648, %v477_v56  ;;  %v487_v1 = vand.u32 2147483647, %v477_v56  ;;  %vm483_vm12 = vweird.f32 %v477_v56 }
 0x1f9   :  { %v521_v58 = vmul.f32 %v1439_v57, %v519_v54  ;;  %vm526_vm15 = vweird.f32 %v1439_v57 }
 0x1fa   :  { %v490_v6 = vor.u32 1.1754944e-38, %v489_v63  ;;  %vm488_vm14 = vcmp.eq.f32.partialorder %v487_v1, 8.507059e+37  ;;  %vm527_vm3 = vmor %vm525_vm0, %vm526_vm15 }
 0x1fb   :  { %v522_v61 = vsub.f32 1.0, %v521_v58 }
 0x1fd   :  { %v523_v2 = vmul.f32 %v1439_v57, %v522_v61 }
 0x1fe   :  { %v1441_v59 = vpop.eup %1440 }
 0x1ff   :  { %v479_v60 = vmul.f32 %v1441_v59, %v477_v56  ;;  %vm484_vm11 = vweird.f32 %v1441_v59  ;;  %v524_v9 = vadd.f32 %v1439_v57, %v523_v2 }
 0x200   :  { %vm485_vm13 = vmor %vm483_vm12, %vm484_vm11 }
 0x201   :  { %v480_v62 = vsub.f32 1.0, %v479_v60  ;;  %v528_v16 = vsel %vm527_vm3, %v1439_v57, %v524_v9 }
 0x202   :  { %v533_v31 = vsel %vm530_vm4, %v532_v21, %v528_v16  ;;  %v689_v21 = vld [vmem:[#allocation2 + $0x6] sm:$0x3] }
 0x203   :  { %v481_v0 = vmul.f32 %v1441_v59, %v480_v62  ;;  %v560_v32 = vsub.f32 1.0, %v533_v31  ;;  %v562_v34 = vmul.f32 %v533_v31, %v1967_v45 }
 0x205   :  { %v482_v5 = vadd.f32 %v1441_v59, %v481_v0 }
 0x207   :  { %v486_v8 = vsel %vm485_vm13, %v1441_v59, %v482_v5  ;;  %v656_v5 = vld [vmem:[#allocation4 + $0x4] sm:$0x3] }
 0x208   :  { %v491_v10 = vsel %vm488_vm14, %v490_v6, %v486_v8 }
 0x209   :  { %v557_v12 = vmul.f32 %v555_v7, %v491_v10 }
 0x20b   :  { %v558_v15 = vadd.f32 %v557_v12, %v536_v14 }
 0x20d   :  { %1442 = vtanh.f32 %v558_v15 }
 0x213   :  { %v1443_v33 = vpop.eup %1442 }
 0x214   :  { %v561_v35 = vmul.f32 %v1443_v33, %v560_v32 }
 0x216   :  { %v563_v36 = vadd.f32 %v562_v34, %v561_v35  ;;  %v734_v34 = vld [vmem:[#allocation3 + $0x6] sm:$0x3] }
 0x218   :  { %564 = vst.msk [vmem:[#allocation6] sm:$0x3] %vm313_vm1, %v563_v36 }
 0x219   :  { %566 = vst.msk [vmem:[#allocation5 + $0x2] sm:$0x3] %vm313_vm1, %v563_v36 }
 0x21f   :  { %v1991_v37 = vld [vmem:[#allocation6] sm:$0x3] }
 0x220   :  { %1373 = vmatmul.msk.f32.vlgmr.msra.gmra.mxu2 %vm214_vm2, %v1991_v37  ;;  %1375 = vmatmul.msk.f32.vlgmr.msra.gmra.mxu3 %vm214_vm2, %v1991_v37 }
 0x221   :  { %1377 = vmatmul.msk.f32.vlgmr.msrb.gmra.mxu0 %vm214_vm2, %v1991_v37  ;;  %909 = vmatpush.msra.mxu2 %v1893_v27 }
 0x222   :  { %945 = vmatpush.msra.mxu3 %v1854_v17  ;;  %987 = vmatpush.msrb.mxu0 %v1856_v18 }
 0x223   :  { %910 = vmatpush.msra.mxu2 %v1895_v28 }
 0x224   :  { %946 = vmatpush.msra.mxu3 %v1858_v19  ;;  %988 = vmatpush.msrb.mxu0 %v1862_v20 }
 0x225   :  { %911 = vmatpush.msra.mxu2 %v1900_v29 }
 0x226   :  { %947 = vmatpush.msra.mxu3 %v1867_v22  ;;  %989 = vmatpush.msrb.mxu0 %v1879_v24 }
 0x227   :  { %912 = vmatpush.msra.mxu2 %v1904_v30 }
 0x228   :  { %948 = vmatpush.msra.mxu3 %v1876_v23  ;;  %990 = vmatpush.msrb.mxu0 %v1881_v25 }
 0x29e   :  { %v674_v58 = vpop.f32.mrf.mxu0 }
 0x29f   :  { %v675_v62 = vadd.f32 %v1961_v4, %v674_v58 }
 0x2a3   :  { %v590_v39 = vpop.f32.mrf.mxu2  ;;  %v632_v41 = vpop.f32.mrf.mxu3 }
 0x2a4   :  { %v593_v42 = vadd.f32 %v590_v39, %v569_v38  ;;  %v635_v43 = vadd.f32 %v632_v41, %v614_v40 }
 0x2a6   :  { %v1374_v44 = vmul.f32 -1.442695, %v593_v42  ;;  %v1376_v45 = vmul.f32 -1.442695, %v635_v43 }
 0x2a8   :  { %1444 = vpow2.f32 %v1374_v44 }
 0x2a9   :  { %1446 = vpow2.f32 %v1376_v45 }
 0x2ae   :  { %v1445_v26 = vpop.eup %1444 }
 0x2af   :  { %v1447_v46 = vpop.eup %1446  ;;  %v597_v47 = vadd.f32 1.0, %v1445_v26 }
 0x2b0   :  { %v639_v48 = vadd.f32 1.0, %v1447_v46 }
 0x2b1   :  { %1448 = vrcp.f32 %v597_v47  ;;  %v609_v54 = vand.u32 2147483648, %v597_v47  ;;  %v607_v57 = vand.u32 2147483647, %v597_v47  ;;  %vm603_vm6 = vweird.f32 %v597_v47 }
 0x2b2   :  { %1450 = vrcp.f32 %v639_v48  ;;  %v651_v3 = vand.u32 2147483648, %v639_v48  ;;  %vm645_vm10 = vweird.f32 %v639_v48  ;;  %v649_v6 = vand.u32 2147483647, %v639_v48 }
 0x2b3   :  { %v610_v61 = vor.u32 1.1754944e-38, %v609_v54  ;;  %vm608_vm8 = vcmp.eq.f32.partialorder %v607_v57, 8.507059e+37 }
 0x2b4   :  { %v652_v9 = vor.u32 1.1754944e-38, %v651_v3  ;;  %vm650_vm12 = vcmp.eq.f32.partialorder %v649_v6, 8.507059e+37 }
 0x2b7   :  { %v1449_v49 = vpop.eup %1448 }
 0x2b8   :  { %v1451_v50 = vpop.eup %1450  ;;  %v599_v51 = vmul.f32 %v1449_v49, %v597_v47  ;;  %vm604_vm5 = vweird.f32 %v1449_v49 }
 0x2b9   :  { %v641_v52 = vmul.f32 %v1451_v50, %v639_v48  ;;  %vm605_vm7 = vmor %vm603_vm6, %vm604_vm5  ;;  %vm646_vm9 = vweird.f32 %v1451_v50 }
 0x2ba   :  { %v600_v53 = vsub.f32 1.0, %v599_v51  ;;  %vm647_vm11 = vmor %vm645_vm10, %vm646_vm9 }
 0x2bb   :  { %v642_v55 = vsub.f32 1.0, %v641_v52 }
 0x2bc   :  { %v601_v56 = vmul.f32 %v1449_v49, %v600_v53 }
 0x2bd   :  { %v643_v59 = vmul.f32 %v1451_v50, %v642_v55 }
 0x2be   :  { %v602_v60 = vadd.f32 %v1449_v49, %v601_v56 }
 0x2bf   :  { %v644_v1 = vadd.f32 %v1451_v50, %v643_v59 }
 0x2c0   :  { %v606_v63 = vsel %vm605_vm7, %v1449_v49, %v602_v60  ;;  %v776_v60 = vld [vmem:[#allocation4 + $0x6] sm:$0x3] }
 0x2c1   :  { %v611_v0 = vsel %vm608_vm8, %v610_v61, %v606_v63  ;;  %v648_v8 = vsel %vm647_vm11, %v1451_v50, %v644_v1 }
 0x2c2   :  { %v677_v2 = vmul.f32 %v675_v62, %v611_v0  ;;  %v653_v10 = vsel %vm650_vm12, %v652_v9, %v648_v8  ;;  %v854_v9 = vld [vmem:[#allocation3 + $0x8] sm:$0x3] }
 0x2c3   :  { %v680_v11 = vsub.f32 1.0, %v653_v10  ;;  %v682_v14 = vmul.f32 %v653_v10, %v1991_v37 }
 0x2c4   :  { %v678_v7 = vadd.f32 %v677_v2, %v656_v5 }
 0x2c6   :  { %1452 = vtanh.f32 %v678_v7 }
 0x2cc   :  { %v1453_v12 = vpop.eup %1452 }
 0x2cd   :  { %v681_v13 = vmul.f32 %v1453_v12, %v680_v11 }
 0x2cf   :  { %v683_v15 = vadd.f32 %v682_v14, %v681_v13 }
 0x2d1   :  { %684 = vst.msk [vmem:[#allocation6] sm:$0x3] %vm313_vm1, %v683_v15 }
 0x2d2   :  { %686 = vst.msk [vmem:[#allocation5 + $0x4] sm:$0x3] %vm313_vm1, %v683_v15 }
 0x2d8   :  { %v2015_v16 = vld [vmem:[#allocation6] sm:$0x3] }
 0x2d9   :  { %1378 = vmatmul.msk.f32.vlgmr.msra.gmra.mxu1 %vm214_vm2, %v2015_v16  ;;  %1380 = vmatmul.msk.f32.vlgmr.msrb.gmra.mxu2 %vm214_vm2, %v2015_v16 }
 0x2da   :  { %1382 = vmatmul.msk.f32.vlgmr.msrb.gmra.mxu3 %vm214_vm2, %v2015_v16  ;;  %1029 = vmatpush.msra.mxu1 %v1893_v27 }
 0x2db   :  { %1065 = vmatpush.msrb.mxu2 %v1854_v17  ;;  %1107 = vmatpush.msrb.mxu3 %v1856_v18 }
 0x2dc   :  { %1030 = vmatpush.msra.mxu1 %v1895_v28 }
 0x2dd   :  { %1066 = vmatpush.msrb.mxu2 %v1858_v19  ;;  %1108 = vmatpush.msrb.mxu3 %v1862_v20 }
 0x2de   :  { %1031 = vmatpush.msra.mxu1 %v1900_v29 }
 0x2df   :  { %1067 = vmatpush.msrb.mxu2 %v1867_v22  ;;  %1109 = vmatpush.msrb.mxu3 %v1879_v24 }
 0x2e0   :  { %1032 = vmatpush.msra.mxu1 %v1904_v30 }
 0x2e1   :  { %1068 = vmatpush.msrb.mxu2 %v1876_v23  ;;  %1110 = vmatpush.msrb.mxu3 %v1881_v25 }
 0x356   :  { %v710_v31 = vpop.f32.mrf.mxu1 }
 0x357   :  { %v713_v32 = vadd.f32 %v710_v31, %v689_v21 }
 0x359   :  { %v1379_v33 = vmul.f32 -1.442695, %v713_v32 }
 0x35b   :  { %1454 = vpow2.f32 %v1379_v33 }
 0x35c   :  { %v752_v35 = vpop.f32.mrf.mxu2 }
 0x35d   :  { %v755_v36 = vadd.f32 %v752_v35, %v734_v34  ;;  %v794_v48 = vpop.f32.mrf.mxu3 }
 0x35e   :  { %v795_v54 = vadd.f32 %v1961_v4, %v794_v48 }
 0x35f   :  { %v1381_v37 = vmul.f32 -1.442695, %v755_v36 }
 0x361   :  { %v1455_v38 = vpop.eup %1454  ;;  %1456 = vpow2.f32 %v1381_v37 }
 0x362   :  { %v717_v39 = vadd.f32 1.0, %v1455_v38 }
 0x364   :  { %1458 = vrcp.f32 %v717_v39  ;;  %v729_v45 = vand.u32 2147483648, %v717_v39  ;;  %v727_v46 = vand.u32 2147483647, %v717_v39  ;;  %vm723_vm14 = vweird.f32 %v717_v39 }
 0x366   :  { %v730_v51 = vor.u32 1.1754944e-38, %v729_v45  ;;  %vm728_vm0 = vcmp.eq.f32.partialorder %v727_v46, 8.507059e+37 }
 0x367   :  { %v1457_v40 = vpop.eup %1456 }
 0x368   :  { %v759_v41 = vadd.f32 1.0, %v1457_v40 }
 0x36a   :  { %v1459_v42 = vpop.eup %1458  ;;  %1460 = vrcp.f32 %v759_v41  ;;  %v771_v57 = vand.u32 2147483648, %v759_v41  ;;  %v769_v59 = vand.u32 2147483647, %v759_v41  ;;  %vm765_vm4 = vweird.f32 %v759_v41 }
 0x36b   :  { %v719_v43 = vmul.f32 %v1459_v42, %v717_v39  ;;  %vm724_vm13 = vweird.f32 %v1459_v42 }
 0x36c   :  { %vm725_vm15 = vmor %vm723_vm14, %vm724_vm13  ;;  %v772_v63 = vor.u32 1.1754944e-38, %v771_v57  ;;  %vm770_vm6 = vcmp.eq.f32.partialorder %v769_v59, 8.507059e+37 }
 0x36d   :  { %v720_v44 = vsub.f32 1.0, %v719_v43 }
 0x36f   :  { %v721_v26 = vmul.f32 %v1459_v42, %v720_v44 }
 0x370   :  { %v1461_v47 = vpop.eup %1460 }
 0x371   :  { %v761_v49 = vmul.f32 %v1461_v47, %v759_v41  ;;  %v722_v50 = vadd.f32 %v1459_v42, %v721_v26  ;;  %vm766_vm3 = vweird.f32 %v1461_v47  ;;  %v896_v26 = vld [vmem:[#allocation4 + $0x8] sm:$0x3] }
 0x372   :  { %vm767_vm5 = vmor %vm765_vm4, %vm766_vm3 }
 0x373   :  { %v762_v52 = vsub.f32 1.0, %v761_v49  ;;  %v726_v53 = vsel %vm725_vm15, %v1459_v42, %v722_v50 }
 0x374   :  { %v731_v55 = vsel %vm728_vm0, %v730_v51, %v726_v53 }
 0x375   :  { %v763_v56 = vmul.f32 %v1461_v47, %v762_v52  ;;  %v797_v58 = vmul.f32 %v795_v54, %v731_v55 }
 0x377   :  { %v764_v61 = vadd.f32 %v1461_v47, %v763_v56  ;;  %v798_v62 = vadd.f32 %v797_v58, %v776_v60  ;;  %v974_v56 = vld [vmem:[#allocation3 + $0xa] sm:$0x3]  ;;  %v929_v60 = vld [vmem:[#allocation2 + $0xa] sm:$0x3] }
 0x379   :  { %v768_v0 = vsel %vm767_vm5, %v1461_v47, %v764_v61  ;;  %1462 = vtanh.f32 %v798_v62 }
 0x37a   :  { %v773_v1 = vsel %vm770_vm6, %v772_v63, %v768_v0 }
 0x37b   :  { %v800_v2 = vsub.f32 1.0, %v773_v1  ;;  %v802_v6 = vmul.f32 %v773_v1, %v2015_v16 }
 0x37f   :  { %v1463_v3 = vpop.eup %1462 }
 0x380   :  { %v801_v5 = vmul.f32 %v1463_v3, %v800_v2 }
 0x382   :  { %v803_v7 = vadd.f32 %v802_v6, %v801_v5 }
 0x384   :  { %804 = vst.msk [vmem:[#allocation6] sm:$0x3] %vm313_vm1, %v803_v7 }
 0x385   :  { %806 = vst.msk [vmem:[#allocation5 + $0x6] sm:$0x3] %vm313_vm1, %v803_v7  ;;  %v1292_v7 = vld [vmem:[%s2144_s14 + $0x18] sm:$0xff] }
 0x38b   :  { %v2039_v8 = vld [vmem:[#allocation6] sm:$0x3] }
 0x38c   :  { %1383 = vmatmul.msk.f32.vlgmr.msra.gmra.mxu0 %vm214_vm2, %v2039_v8  ;;  %1385 = vmatmul.msk.f32.vlgmr.msrb.gmra.mxu1 %vm214_vm2, %v2039_v8 }
 0x38d   :  { %1387 = vmatmul.msk.f32.vlgmr.msra.gmra.mxu2 %vm214_vm2, %v2039_v8  ;;  %1149 = vmatpush.msra.mxu0 %v1893_v27 }
 0x38e   :  { %1185 = vmatpush.msrb.mxu1 %v1854_v17  ;;  %1227 = vmatpush.msra.mxu2 %v1856_v18  ;;  %v809_v17 = vld [vmem:[#allocation2 + $0x8] sm:$0x3] }
 0x38f   :  { %1150 = vmatpush.msra.mxu0 %v1895_v28 }
 0x390   :  { %1186 = vmatpush.msrb.mxu1 %v1858_v19  ;;  %1228 = vmatpush.msra.mxu2 %v1862_v20 }
 0x391   :  { %1151 = vmatpush.msra.mxu0 %v1900_v29 }
 0x392   :  { %1187 = vmatpush.msrb.mxu1 %v1867_v22  ;;  %1229 = vmatpush.msra.mxu2 %v1879_v24 }
 0x393   :  { %1152 = vmatpush.msra.mxu0 %v1904_v30 }
 0x394   :  { %1188 = vmatpush.msrb.mxu1 %v1876_v23  ;;  %1230 = vmatpush.msra.mxu2 %v1881_v25 }
 0x409   :  { %v830_v18 = vpop.f32.mrf.mxu0  ;;  %v872_v10 = vpop.f32.mrf.mxu1 }
 0x40a   :  { %v833_v11 = vadd.f32 %v830_v18, %v809_v17  ;;  %v875_v19 = vadd.f32 %v872_v10, %v854_v9  ;;  %v1290_v10 = vld [vmem:[%s2144_s14 + $0x8] sm:$0xff] }
 0x40c   :  { %v1384_v12 = vmul.f32 -1.442695, %v833_v11  ;;  %v1386_v20 = vmul.f32 -1.442695, %v875_v19 }
 0x40e   :  { %1464 = vpow2.f32 %v1384_v12 }
 0x40f   :  { %1466 = vpow2.f32 %v1386_v20  ;;  %v1289_v20 = vld [vmem:[%s2144_s14] sm:$0xff] }
 0x410   :  { %v914_v36 = vpop.f32.mrf.mxu2 }
 0x411   :  { %v915_v40 = vadd.f32 %v1961_v4, %v914_v36 }
 0x414   :  { %v1465_v13 = vpop.eup %1464 }
 0x415   :  { %v1467_v22 = vpop.eup %1466  ;;  %v837_v14 = vadd.f32 1.0, %v1465_v13 }
 0x416   :  { %v879_v24 = vadd.f32 1.0, %v1467_v22 }
 0x417   :  { %1468 = vrcp.f32 %v837_v14  ;;  %v849_v32 = vand.u32 2147483648, %v837_v14  ;;  %v847_v34 = vand.u32 2147483647, %v837_v14  ;;  %vm843_vm8 = vweird.f32 %v837_v14 }
 0x418   :  { %1470 = vrcp.f32 %v879_v24  ;;  %v891_v43 = vand.u32 2147483648, %v879_v24  ;;  %vm885_vm12 = vweird.f32 %v879_v24  ;;  %v889_v45 = vand.u32 2147483647, %v879_v24 }
 0x419   :  { %v850_v38 = vor.u32 1.1754944e-38, %v849_v32  ;;  %vm848_vm10 = vcmp.eq.f32.partialorder %v847_v34, 8.507059e+37 }
 0x41a   :  { %v892_v48 = vor.u32 1.1754944e-38, %v891_v43  ;;  %vm890_vm14 = vcmp.eq.f32.partialorder %v889_v45, 8.507059e+37  ;;  %v1049_v43 = vld [vmem:[#allocation2 + $0xc] sm:$0x3]  ;;  %v1094_v45 = vld [vmem:[#allocation3 + $0xc] sm:$0x3] }
 0x41d   :  { %v1469_v15 = vpop.eup %1468 }
 0x41e   :  { %v1471_v23 = vpop.eup %1470  ;;  %v839_v16 = vmul.f32 %v1469_v15, %v837_v14  ;;  %vm844_vm7 = vweird.f32 %v1469_v15 }
 0x41f   :  { %v881_v25 = vmul.f32 %v1471_v23, %v879_v24  ;;  %vm845_vm9 = vmor %vm843_vm8, %vm844_vm7  ;;  %vm886_vm11 = vweird.f32 %v1471_v23 }
 0x420   :  { %v840_v21 = vsub.f32 1.0, %v839_v16  ;;  %vm887_vm13 = vmor %vm885_vm12, %vm886_vm11 }
 0x421   :  { %v882_v31 = vsub.f32 1.0, %v881_v25 }
 0x422   :  { %v841_v33 = vmul.f32 %v1469_v15, %v840_v21  ;;  %v1016_v21 = vld [vmem:[#allocation4 + $0xa] sm:$0x3] }
 0x423   :  { %v883_v35 = vmul.f32 %v1471_v23, %v882_v31 }
 0x424   :  { %v842_v37 = vadd.f32 %v1469_v15, %v841_v33 }
 0x425   :  { %v884_v41 = vadd.f32 %v1471_v23, %v883_v35 }
 0x426   :  { %v846_v39 = vsel %vm845_vm9, %v1469_v15, %v842_v37  ;;  %vm1326_vm9 = vcmask 48128  }
 0x427   :  { %v851_v42 = vsel %vm848_vm10, %v850_v38, %v846_v39  ;;  %v888_v47 = vsel %vm887_vm13, %v1471_v23, %v884_v41  ;;  %v1287_v41 = vld [vmem:[#allocation5] sm:$0xff] }
 0x428   :  { %v917_v44 = vmul.f32 %v915_v40, %v851_v42  ;;  %v893_v49 = vsel %vm890_vm14, %v892_v48, %v888_v47 }
 0x429   :  { %v920_v50 = vsub.f32 1.0, %v893_v49  ;;  %v922_v53 = vmul.f32 %v893_v49, %v2039_v8  ;;  %v1291_v8 = vld [vmem:[%s2144_s14 + $0x10] sm:$0xff] }
 0x42a   :  { %v918_v46 = vadd.f32 %v917_v44, %v896_v26 }
 0x42c   :  { %1472 = vtanh.f32 %v918_v46  ;;  %v2103_v46 = vld [vmem:[%s2145_s15] ss:$0 sm:$0xff]  ;;  %s1715_s15 = smov [#allocation19]  }
 0x42d   :  { %s1338_s27 = sshll.u32 %s1715_s15, 4  ;;  %s1339_s27 = int_to_ptr.vmem [resolvable:$true] %s1338_s27 }
 0x432   :  { %v1473_v51 = vpop.eup %1472 }
 0x433   :  { %v921_v52 = vmul.f32 %v1473_v51, %v920_v50 }
 0x435   :  { %v923_v54 = vadd.f32 %v922_v53, %v921_v52 }
 0x437   :  { %926 = vst.msk [vmem:[#allocation5 + $0x8] sm:$0x3] %vm313_vm1, %v923_v54 }
 0x438   :  { %924 = vst.msk [vmem:[#allocation6] sm:$0x3] %vm313_vm1, %v923_v54 }
 0x43f   :  { %v2063_v55 = vld [vmem:[#allocation6] sm:$0x3] }
 0x440   :  { %1388 = vmatmul.msk.f32.vlgmr.msra.gmra.mxu3 %vm214_vm2, %v2063_v55  ;;  %1390 = vmatmul.msk.f32.vlgmr.msrb.gmra.mxu0 %vm214_vm2, %v2063_v55 }
 0x441   :  { %1392 = vmatmul.msk.f32.vlgmr.msra.gmra.mxu1 %vm214_vm2, %v2063_v55  ;;  %1269 = vmatpush.msra.mxu3 %v1893_v27 }
 0x442   :  { %1315 = vmatpush.msrb.mxu0 %v1292_v7 }
 0x443   :  { %1270 = vmatpush.msra.mxu3 %v1895_v28 }
 0x444   :  { %1316 = vmatpush.msrb.mxu0 %v1291_v8  ;;  %v1136_v8 = vld [vmem:[#allocation4 + $0xc] sm:$0x3] }
 0x445   :  { %1271 = vmatpush.msra.mxu3 %v1900_v29 }
 0x446   :  { %1317 = vmatpush.msrb.mxu0 %v1290_v10 }
 0x447   :  { %1272 = vmatpush.msra.mxu3 %v1904_v30 }
 0x448   :  { %1318 = vmatpush.msrb.mxu0 %v1289_v20 }
 0x4bd   :  { %v992_v57 = vpop.f32.mrf.mxu0 }
 0x4be   :  { %v995_v58 = vadd.f32 %v992_v57, %v974_v56  ;;  %v1034_v19 = vpop.f32.mrf.mxu1 }
 0x4bf   :  { %v1035_v22 = vadd.f32 %v1961_v4, %v1034_v19 }
 0x4c0   :  { %v1391_v59 = vmul.f32 -1.442695, %v995_v58 }
 0x4c2   :  { %1474 = vpow2.f32 %v1391_v59 }
 0x4c3   :  { %v950_v61 = vpop.f32.mrf.mxu3 }
 0x4c4   :  { %v953_v62 = vadd.f32 %v950_v61, %v929_v60 }
 0x4c6   :  { %v1389_v63 = vmul.f32 -1.442695, %v953_v62 }
 0x4c8   :  { %v1475_v0 = vpop.eup %1474  ;;  %1476 = vpow2.f32 %v1389_v63 }
 0x4c9   :  { %v999_v1 = vadd.f32 1.0, %v1475_v0 }
 0x4cb   :  { %1478 = vrcp.f32 %v999_v1  ;;  %v1011_v23 = vand.u32 2147483648, %v999_v1  ;;  %vm1005_vm6 = vweird.f32 %v999_v1  ;;  %v1009_v25 = vand.u32 2147483647, %v999_v1 }
 0x4cd   :  { %v1012_v33 = vor.u32 1.1754944e-38, %v1011_v23  ;;  %vm1010_vm8 = vcmp.eq.f32.partialorder %v1009_v25, 8.507059e+37  ;;  %v1214_v25 = vld [vmem:[#allocation3 + $0xe] sm:$0x3] }
 0x4ce   :  { %v1477_v27 = vpop.eup %1476 }
 0x4cf   :  { %v957_v2 = vadd.f32 1.0, %v1477_v27 }
 0x4d1   :  { %1480 = vrcp.f32 %v957_v2  ;;  %v1479_v28 = vpop.eup %1478  ;;  %v969_v17 = vand.u32 2147483648, %v957_v2  ;;  %v967_v9 = vand.u32 2147483647, %v957_v2  ;;  %vm963_vm0 = vweird.f32 %v957_v2 }
 0x4d2   :  { %v1001_v29 = vmul.f32 %v1479_v28, %v999_v1  ;;  %vm1006_vm5 = vweird.f32 %v1479_v28 }
 0x4d3   :  { %v970_v13 = vor.u32 1.1754944e-38, %v969_v17  ;;  %vm968_vm4 = vcmp.eq.f32.partialorder %v967_v9, 8.507059e+37  ;;  %vm1007_vm7 = vmor %vm1005_vm6, %vm1006_vm5 }
 0x4d4   :  { %v1002_v5 = vsub.f32 1.0, %v1001_v29 }
 0x4d6   :  { %v1003_v11 = vmul.f32 %v1479_v28, %v1002_v5 }
 0x4d7   :  { %v1481_v3 = vpop.eup %1480 }
 0x4d8   :  { %v959_v30 = vmul.f32 %v1481_v3, %v957_v2  ;;  %vm964_vm15 = vweird.f32 %v1481_v3  ;;  %v1004_v24 = vadd.f32 %v1479_v28, %v1003_v11 }
 0x4d9   :  { %vm965_vm3 = vmor %vm963_vm0, %vm964_vm15 }
 0x4da   :  { %v960_v6 = vsub.f32 1.0, %v959_v30  ;;  %v1008_v32 = vsel %vm1007_vm7, %v1479_v28, %v1004_v24  ;;  %v1169_v24 = vld [vmem:[#allocation2 + $0xe] sm:$0x3] }
 0x4db   :  { %v1013_v34 = vsel %vm1010_vm8, %v1012_v33, %v1008_v32 }
 0x4dc   :  { %v961_v18 = vmul.f32 %v1481_v3, %v960_v6  ;;  %v1040_v35 = vsub.f32 1.0, %v1013_v34  ;;  %v1042_v37 = vmul.f32 %v1013_v34, %v2063_v55 }
 0x4de   :  { %v962_v12 = vadd.f32 %v1481_v3, %v961_v18 }
 0x4e0   :  { %v966_v14 = vsel %vm965_vm3, %v1481_v3, %v962_v12 }
 0x4e1   :  { %v971_v15 = vsel %vm968_vm4, %v970_v13, %v966_v14 }
 0x4e2   :  { %v1037_v16 = vmul.f32 %v1035_v22, %v971_v15 }
 0x4e4   :  { %v1038_v31 = vadd.f32 %v1037_v16, %v1016_v21 }
 0x4e6   :  { %1482 = vtanh.f32 %v1038_v31 }
 0x4ec   :  { %v1483_v36 = vpop.eup %1482 }
 0x4ed   :  { %v1041_v38 = vmul.f32 %v1483_v36, %v1040_v35 }
 0x4ef   :  { %v1043_v39 = vadd.f32 %v1042_v37, %v1041_v38 }
 0x4f1   :  { %1044 = vst.msk [vmem:[#allocation6] sm:$0x3] %vm313_vm1, %v1043_v39 }
 0x4f2   :  { %1046 = vst.msk [vmem:[#allocation5 + $0xa] sm:$0x3] %vm313_vm1, %v1043_v39 }
 0x4f8   :  { %v2091_v40 = vld [vmem:[#allocation6] sm:$0x3] }
 0x4f9   :  { %1393 = vmatmul.msk.f32.vlgmr.msrb.gmra.mxu2 %vm214_vm2, %v2091_v40  ;;  %1395 = vmatmul.msk.f32.vlgmr.msrb.gmra.mxu3 %vm214_vm2, %v2091_v40 }
 0x4fa   :  { %1397 = vmatmul.msk.f32.vlgmr.msra.gmra.mxu0 %vm214_vm2, %v2091_v40 }
 0x502   :  { %1403 = vmatmul.msk.f32.vlgmr.msrb.gmra.mxu0 %vm214_vm2, %v1287_v41 }
 0x577   :  { %v1154_v42 = vpop.f32.mrf.mxu0 }
 0x578   :  { %v1155_v29 = vadd.f32 %v1961_v4, %v1154_v42 }
 0x57c   :  { %v1070_v44 = vpop.f32.mrf.mxu2  ;;  %v1112_v26 = vpop.f32.mrf.mxu3 }
 0x57d   :  { %v1073_v47 = vadd.f32 %v1070_v44, %v1049_v43  ;;  %v1115_v48 = vadd.f32 %v1112_v26, %v1094_v45 }
 0x57f   :  { %v1394_v49 = vmul.f32 -1.442695, %v1073_v47  ;;  %v1396_v50 = vmul.f32 -1.442695, %v1115_v48  ;;  %v1320_v51 = vpop.f32.mrf.mxu0 }
 0x580   :  { %v1321_v52 = vadd.f32 %v2103_v46, %v1320_v51 }
 0x581   :  { %1484 = vpow2.f32 %v1394_v49 }
 0x582   :  { %1486 = vpow2.f32 %v1396_v50  ;;  %1327 = vst.msk [vmem:[%s2146_s16] sm:$0xff] %vm1326_vm9, %v1321_v52 }
 0x587   :  { %v1485_v53 = vpop.eup %1484 }
 0x588   :  { %v1487_v54 = vpop.eup %1486  ;;  %v1077_v55 = vadd.f32 1.0, %v1485_v53 }
 0x589   :  { %v1119_v56 = vadd.f32 1.0, %v1487_v54 }
 0x58a   :  { %1488 = vrcp.f32 %v1077_v55  ;;  %v1089_v62 = vand.u32 2147483648, %v1077_v55  ;;  %v1087_v1 = vand.u32 2147483647, %v1077_v55  ;;  %vm1083_vm11 = vweird.f32 %v1077_v55 }
 0x58b   :  { %1490 = vrcp.f32 %v1119_v56  ;;  %v1131_v7 = vand.u32 2147483648, %v1119_v56  ;;  %vm1125_vm15 = vweird.f32 %v1119_v56  ;;  %v1129_v17 = vand.u32 2147483647, %v1119_v56 }
 0x58c   :  { %v1090_v28 = vor.u32 1.1754944e-38, %v1089_v62  ;;  %vm1088_vm13 = vcmp.eq.f32.partialorder %v1087_v1, 8.507059e+37 }
 0x58d   :  { %v1132_v10 = vor.u32 1.1754944e-38, %v1131_v7  ;;  %vm1130_vm3 = vcmp.eq.f32.partialorder %v1129_v17, 8.507059e+37 }
 0x590   :  { %v1489_v57 = vpop.eup %1488 }
 0x591   :  { %v1491_v58 = vpop.eup %1490  ;;  %v1079_v59 = vmul.f32 %v1489_v57, %v1077_v55  ;;  %vm1084_vm10 = vweird.f32 %v1489_v57 }
 0x592   :  { %v1121_v60 = vmul.f32 %v1491_v58, %v1119_v56  ;;  %vm1085_vm12 = vmor %vm1083_vm11, %vm1084_vm10  ;;  %vm1126_vm14 = vweird.f32 %v1491_v58  ;;  %v1256_v56 = vld [vmem:[#allocation4 + $0xe] sm:$0x3] }
 0x593   :  { %v1080_v61 = vsub.f32 1.0, %v1079_v59  ;;  %vm1127_vm0 = vmor %vm1125_vm15, %vm1126_vm14 }
 0x594   :  { %v1122_v63 = vsub.f32 1.0, %v1121_v60 }
 0x595   :  { %v1081_v0 = vmul.f32 %v1489_v57, %v1080_v61 }
 0x596   :  { %v1123_v27 = vmul.f32 %v1491_v58, %v1122_v63 }
 0x597   :  { %v1082_v2 = vadd.f32 %v1489_v57, %v1081_v0 }
 0x598   :  { %v1124_v5 = vadd.f32 %v1491_v58, %v1123_v27 }
 0x599   :  { %v1086_v3 = vsel %vm1085_vm12, %v1489_v57, %v1082_v2 }
 0x59a   :  { %v1091_v30 = vsel %vm1088_vm13, %v1090_v28, %v1086_v3  ;;  %v1128_v9 = vsel %vm1127_vm0, %v1491_v58, %v1124_v5 }
 0x59b   :  { %v1157_v6 = vmul.f32 %v1155_v29, %v1091_v30  ;;  %v1133_v11 = vsel %vm1130_vm3, %v1132_v10, %v1128_v9 }
 0x59c   :  { %v1160_v19 = vsub.f32 1.0, %v1133_v11  ;;  %v1162_v13 = vmul.f32 %v1133_v11, %v2091_v40 }
 0x59d   :  { %v1158_v18 = vadd.f32 %v1157_v6, %v1136_v8 }
 0x59f   :  { %1492 = vtanh.f32 %v1158_v18 }
 0x5a5   :  { %v1493_v12 = vpop.eup %1492 }
 0x5a6   :  { %v1161_v20 = vmul.f32 %v1493_v12, %v1160_v19 }
 0x5a8   :  { %v1163_v22 = vadd.f32 %v1162_v13, %v1161_v20 }
 0x5aa   :  { %1166 = vst.msk [vmem:[#allocation5 + $0xc] sm:$0x3] %vm313_vm1, %v1163_v22 }
 0x5ab   :  { %1164 = vst.msk [vmem:[#allocation6] sm:$0x3] %vm313_vm1, %v1163_v22 }
 0x5b2   :  { %v1167_v14 = vld [vmem:[#allocation6] sm:$0x3] }
 0x5b3   :  { %1398 = vmatmul.msk.f32.vlgmr.msrb.gmra.mxu1 %vm214_vm2, %v1167_v14  ;;  %1400 = vmatmul.msk.f32.vlgmr.msra.gmra.mxu2 %vm214_vm2, %v1167_v14 }
 0x5b4   :  { %1402 = vmatmul.msk.f32.vlgmr.msra.gmra.mxu3 %vm214_vm2, %v1167_v14 }
 0x630   :  { %v1190_v15 = vpop.f32.mrf.mxu1 }
 0x631   :  { %v1193_v23 = vadd.f32 %v1190_v15, %v1169_v24 }
 0x633   :  { %v1399_v16 = vmul.f32 -1.442695, %v1193_v23 }
 0x635   :  { %1494 = vpow2.f32 %v1399_v16 }
 0x636   :  { %v1232_v21 = vpop.f32.mrf.mxu2 }
 0x637   :  { %v1235_v31 = vadd.f32 %v1232_v21, %v1214_v25  ;;  %v1274_v44 = vpop.f32.mrf.mxu3 }
 0x638   :  { %v1275_v50 = vadd.f32 %v1961_v4, %v1274_v44 }
 0x639   :  { %v1401_v32 = vmul.f32 -1.442695, %v1235_v31 }
 0x63b   :  { %v1495_v33 = vpop.eup %1494  ;;  %1496 = vpow2.f32 %v1401_v32 }
 0x63c   :  { %v1197_v34 = vadd.f32 1.0, %v1495_v33 }
 0x63e   :  { %1498 = vrcp.f32 %v1197_v34  ;;  %v1209_v40 = vand.u32 2147483648, %v1197_v34  ;;  %v1207_v42 = vand.u32 2147483647, %v1197_v34  ;;  %vm1203_vm5 = vweird.f32 %v1197_v34 }
 0x640   :  { %v1210_v47 = vor.u32 1.1754944e-38, %v1209_v40  ;;  %vm1208_vm7 = vcmp.eq.f32.partialorder %v1207_v42, 8.507059e+37 }
 0x641   :  { %v1497_v35 = vpop.eup %1496 }
 0x642   :  { %v1239_v36 = vadd.f32 1.0, %v1497_v35 }
 0x644   :  { %v1499_v37 = vpop.eup %1498  ;;  %1500 = vrcp.f32 %v1239_v36  ;;  %v1251_v53 = vand.u32 2147483648, %v1239_v36  ;;  %v1249_v55 = vand.u32 2147483647, %v1239_v36  ;;  %vm1245_vm10 = vweird.f32 %v1239_v36 }
 0x645   :  { %v1199_v38 = vmul.f32 %v1499_v37, %v1197_v34  ;;  %vm1204_vm4 = vweird.f32 %v1499_v37 }
 0x646   :  { %vm1205_vm6 = vmor %vm1203_vm5, %vm1204_vm4  ;;  %v1252_v59 = vor.u32 1.1754944e-38, %v1251_v53  ;;  %vm1250_vm12 = vcmp.eq.f32.partialorder %v1249_v55, 8.507059e+37 }
 0x647   :  { %v1200_v39 = vsub.f32 1.0, %v1199_v38 }
 0x649   :  { %v1201_v41 = vmul.f32 %v1499_v37, %v1200_v39 }
 0x64a   :  { %v1501_v43 = vpop.eup %1500 }
 0x64b   :  { %v1241_v45 = vmul.f32 %v1501_v43, %v1239_v36  ;;  %v1202_v26 = vadd.f32 %v1499_v37, %v1201_v41  ;;  %vm1246_vm8 = vweird.f32 %v1501_v43 }
 0x64c   :  { %vm1247_vm11 = vmor %vm1245_vm10, %vm1246_vm8 }
 0x64d   :  { %v1242_v48 = vsub.f32 1.0, %v1241_v45  ;;  %v1206_v49 = vsel %vm1205_vm6, %v1499_v37, %v1202_v26 }
 0x64e   :  { %v1211_v51 = vsel %vm1208_vm7, %v1210_v47, %v1206_v49 }
 0x64f   :  { %v1243_v52 = vmul.f32 %v1501_v43, %v1242_v48  ;;  %v1277_v54 = vmul.f32 %v1275_v50, %v1211_v51 }
 0x651   :  { %v1244_v57 = vadd.f32 %v1501_v43, %v1243_v52  ;;  %v1278_v58 = vadd.f32 %v1277_v54, %v1256_v56 }
 0x653   :  { %v1248_v60 = vsel %vm1247_vm11, %v1501_v43, %v1244_v57  ;;  %1502 = vtanh.f32 %v1278_v58 }
 0x654   :  { %v1253_v61 = vsel %vm1250_vm12, %v1252_v59, %v1248_v60 }
 0x655   :  { %v1280_v62 = vsub.f32 1.0, %v1253_v61  ;;  %v1282_v4 = vmul.f32 %v1253_v61, %v1167_v14 }
 0x659   :  { %v1503_v63 = vpop.eup %1502 }
 0x65a   :  { %v1281_v0 = vmul.f32 %v1503_v63, %v1280_v62 }
 0x65c   :  { %v1283_v1 = vadd.f32 %v1282_v4, %v1281_v0 }
 0x65e   :  { %1286 = vst.msk [vmem:[#allocation5 + $0xe] sm:$0x3] %vm313_vm1, %v1283_v1 }
 0x65f   :  { %1284 = vst.msk [vmem:[#allocation6] sm:$0x3] %vm313_vm1, %v1283_v1 }
 0x665   :  { %v1288_v27 = vld [vmem:[#allocation5 + $0x8] sm:$0xff] }
 0x666   :  { %1404 = vmatmul.msk.f32.gmra.mxu0 %vm214_vm2, %v1288_v27  ;;  %v1329_v2 = vld [vmem:[#allocation6] sm:$0x3] }
 0x667   :  { %1330 = vst.msk [vmem:[#allocation19] sm:$0x3] %vm313_vm1, %v1329_v2 }
 0x668   :  { %1343 = dma.vmem_to_hbm [thread:$0]  %s1339_s27, 32, %s1341_s18, [#allocation9]  }
 0x6e3   :  { %v1323_v28 = vpop.f32.mrf.mxu0 }
 0x6e4   :  { %v1324_v29 = vadd.f32 %v2103_v46, %v1323_v28 }
 0x6e6   :  { %1328 = vst.msk [vmem:[%s2146_s16 + $0x8] sm:$0xff] %vm1326_vm9, %v1324_v29 }
 0x6e7   :  { %1704 = dma.done.wait [#allocation9], 32  }
 0x6e8   :  { %1705 = vsyncadd [#allocation9], 4294967264 }
 0x6e9   :  { %1350 = vsyncpa [#allocation8], 1 }
 0x6ea   :  { %1351 = vsyncpa [#allocation11], 1 }
 0x6eb   :  { %1352 = vsyncpa [#allocation14], 1 }
 0x6ec   :  { %1353 = vsyncpa [#allocation17], 1 }
 0x6ed   :  { %1354 = vsyncpa [#allocation9], 1 }

</bundles_post_ra>
